<compile_context>
chip_gen: v7x
topology: tpu7x:2x2x1
jax: 0.10.0
libtpu: 0.0.40
codegen_flags: <defaults>
</compile_context>

<pallas_src>
import math
from typing import NamedTuple

import jax
import jax.numpy as jnp
from jax.experimental import pallas as pl
from jax.experimental.pallas import tpu as pltpu


_NEG_PAD = -1.0e30  # bias for padded logit lanes: exp() -> 0, max unaffected


def _round_up(x, m):
    return (x + m - 1) // m * m


class PackedRNN(NamedTuple):
    w_x: jax.Array          # (I_pad, F_pad) bf16 — input rows of fused [i2h | i2o]
    w_h: jax.Array          # (H_pad, F_pad) bf16 — hidden rows of fused weight
    b: jax.Array            # (1, F_pad)     f32  — fused bias (padded logits = -1e30)
    input_size: int
    hidden_size: int
    output_size: int
    i_pad: int
    h_pad: int
    o_pad: int


def rnn_seq_kernel(x_ref, h0_ref, wx_ref, wh_ref, b_ref, out_ref, h_scr):
    """One grid step = one (batch_tile, time_block).

    Grid order matters: batch is the OUTER ("parallel") axis, time blocks are
    the INNER ("arbitrary") axis, so for a fixed batch tile the time blocks run
    consecutively and h_scr carries the recurrence; pl.when(tb == 0) re-seeds
    it when a new batch tile starts.  Do not swap the grid axes.

    x_ref : (T_BLK, b_tile, I_pad)  bf16
    h0_ref: (b_tile, H_pad)         f32   (read only at tb == 0)
    wx_ref: (I_pad, F_pad)          bf16
    wh_ref: (H_pad, F_pad)          bf16
    b_ref : (1, F_pad)              f32
    out_ref:(T_BLK, b_tile, F_pad)  bf16  per-step slab [hidden | log-probs]
    h_scr : (b_tile, H_pad)         f32   VMEM-carried hidden state
    """
    tb = pl.program_id(1)
    t_blk, b_tile, i_pad = x_ref.shape
    h_pad = h_scr.shape[-1]
    f_pad = out_ref.shape[-1]

    @pl.when(tb == 0)
    def _():
        h_scr[...] = h0_ref[...]

    # Hoisted, time-independent input projection (+ bias) for the whole block:
    # a single big MXU GEMM outside the latency-critical recurrence.
    x_all = x_ref[...].reshape(t_blk * b_tile, i_pad)
    xproj = (jnp.dot(x_all, wx_ref[...], preferred_element_type=jnp.float32)
             + b_ref[...])                                   # (T_BLK*b_tile, F_pad) f32

    wh = wh_ref[...]
    # Lane mask selecting the log-softmax half of the fused slab.  Hoisted:
    # JAX does not CSE broadcast_in_dim, so build it once per block.
    lane = jax.lax.broadcasted_iota(jnp.int32, (b_tile, f_pad), 1)
    is_logit = lane >= h_pad

    h = h_scr[...]                                           # f32 carry
    for tl in range(t_blk):                                  # statically unrolled
        y = xproj[tl * b_tile:(tl + 1) * b_tile] + jnp.dot(
            h.astype(jnp.bfloat16), wh, preferred_element_type=jnp.float32)
        new_h = y[:, :h_pad]
        logits = y[:, h_pad:]
        # Numerically stable log-softmax in f32.  Padded logit lanes carry a
        # -1e30 bias, so they contribute exp(.) == 0 and never win the max.
        m = jnp.max(logits, axis=1, keepdims=True)
        lse = jnp.log(jnp.sum(jnp.exp(logits - m), axis=1, keepdims=True))
        # Fused slab in one VPU pass (no concatenate): hidden lanes pass
        # through, logit lanes become log-probs.  One lane-dense bf16 store.
        out_ref[tl] = (y - jnp.where(is_logit, m + lse, 0.0)).astype(out_ref.dtype)
        h = new_h
    h_scr[...] = h


def init_params(key, input_size, hidden_size, output_size):
    """nn.Linear-style U(-1/sqrt(fan_in), 1/sqrt(fan_in)) init.
    Weights stored transposed: (in_features, out_features), f32."""
    fan_in = input_size + hidden_size
    bound = 1.0 / math.sqrt(fan_in)
    k1, k2, k3, k4 = jax.random.split(key, 4)
    w_i2h = jax.random.uniform(k1, (fan_in, hidden_size), jnp.float32, -bound, bound)
    b_i2h = jax.random.uniform(k2, (1, hidden_size), jnp.float32, -bound, bound)
    w_i2o = jax.random.uniform(k3, (fan_in, output_size), jnp.float32, -bound, bound)
    b_i2o = jax.random.uniform(k4, (1, output_size), jnp.float32, -bound, bound)
    return w_i2h, b_i2h, w_i2o, b_i2o


def pack_params(params, input_size):
    """Fuse [i2h | i2o] along the output axis, split rows by input/hidden, and
    pad every lane dimension to a multiple of 128 (lane-dense loads/stores,
    full MXU lanes).  Weights -> bf16 (MXU inputs); bias stays f32."""
    w_i2h, b_i2h, w_i2o, b_i2o = params
    hidden_size = w_i2h.shape[1]
    output_size = w_i2o.shape[1]
    i_pad = _round_up(input_size, 128)
    h_pad = _round_up(hidden_size, 128)
    o_pad = _round_up(output_size, 128)
    f_pad = h_pad + o_pad

    w_x = jnp.zeros((i_pad, f_pad), jnp.float32)
    w_x = w_x.at[:input_size, :hidden_size].set(w_i2h[:input_size])
    w_x = w_x.at[:input_size, h_pad:h_pad + output_size].set(w_i2o[:input_size])

    w_h = jnp.zeros((h_pad, f_pad), jnp.float32)
    w_h = w_h.at[:hidden_size, :hidden_size].set(w_i2h[input_size:])
    w_h = w_h.at[:hidden_size, h_pad:h_pad + output_size].set(w_i2o[input_size:])

    b = jnp.zeros((1, f_pad), jnp.float32)
    b = b.at[:, :hidden_size].set(b_i2h)
    b = b.at[:, h_pad:h_pad + output_size].set(b_i2o)
    # Padded logit lanes: huge negative bias so the in-kernel log-softmax is
    # unaffected.  Padded hidden lanes keep zero bias so they stay exactly 0.
    b = b.at[:, h_pad + output_size:].set(_NEG_PAD)

    return PackedRNN(w_x.astype(jnp.bfloat16), w_h.astype(jnp.bfloat16), b,
                     input_size, hidden_size, output_size, i_pad, h_pad, o_pad)


def _pick_b_tile(batch):
    """Adaptive batch tile: full (8-rounded) batch when it fits one tile,
    otherwise the largest power-of-two tile that does not over-pad."""
    b8 = _round_up(batch, 8)
    if b8 <= 128:
        return b8
    # TODO(synk): on v7x (2 TensorCores) prefer a tile giving >= 2 batch tiles
    # even for modest batches so both cores get "parallel" work.
    for cand in (128, 64, 32, 16, 8):
        if _round_up(batch, cand) - batch <= max(batch // 4, 8):
            return cand
    return 8


def rnn_sequence_forward(xs, h0, packed, t_block=8):
    """xs: (T, B, input_size), h0: (B, hidden_size).  Full recurrence inside
    one pallas_call.  Returns (log_probs (T, B, O) f32, hiddens (T, B, H) f32)."""
    w_x, w_h, b = packed.w_x, packed.w_h, packed.b
    T, B, _ = xs.shape
    I, H, O = packed.input_size, packed.hidden_size, packed.output_size
    i_pad, h_pad, o_pad = packed.i_pad, packed.h_pad, packed.o_pad
    f_pad = h_pad + o_pad

    t_blk = max(1, min(t_block, T))
    T_pad = _round_up(T, t_blk)
    b_tile = _pick_b_tile(B)
    B_pad = _round_up(B, b_tile)
    num_b = B_pad // b_tile
    num_t = T_pad // t_blk

    # Pad: time to a T_BLK multiple, batch to the tile, lanes to 128 multiples.
    # NOTE: padded batch rows run a bias-seeded linear recurrence; they are
    # sliced off below and harmless at these sizes.
    xs_p = jnp.pad(xs, ((0, T_pad - T), (0, B_pad - B),
                        (0, i_pad - I))).astype(jnp.bfloat16)
    h0_p = jnp.pad(h0.astype(jnp.float32), ((0, B_pad - B), (0, h_pad - H)))

    cost = pl.CostEstimate(
        flops=2 * T_pad * B_pad * (i_pad + h_pad) * f_pad,
        transcendentals=T_pad * B_pad * (o_pad + 1),
        bytes_accessed=(xs_p.size * 2 + w_x.size * 2 + w_h.size * 2
                        + b.size * 4 + h0_p.size * 4 + T_pad * B_pad * f_pad * 2),
    )

    slab = pl.pallas_call(
        rnn_seq_kernel,
        out_shape=jax.ShapeDtypeStruct((T_pad, B_pad, f_pad), jnp.bfloat16),
        grid=(num_b, num_t),
        in_specs=[
            # x: one T-block, one batch tile per grid step.
            pl.BlockSpec((t_blk, b_tile, i_pad), lambda bi, tb: (tb, bi, 0)),
            # h0: consumed only at tb == 0, blocked over batch.
            pl.BlockSpec((b_tile, h_pad), lambda bi, tb: (bi, 0)),
            # Fused weights / bias: same block every step -> VMEM resident.
            pl.BlockSpec((i_pad, f_pad), lambda bi, tb: (0, 0)),
            pl.BlockSpec((h_pad, f_pad), lambda bi, tb: (0, 0)),
            pl.BlockSpec((1, f_pad), lambda bi, tb: (0, 0)),
        ],
        out_specs=pl.BlockSpec((t_blk, b_tile, f_pad), lambda bi, tb: (tb, bi, 0)),
        scratch_shapes=[pltpu.VMEM((b_tile, h_pad), jnp.float32)],
        compiler_params=pltpu.CompilerParams(
            dimension_semantics=("parallel", "arbitrary"),
            vmem_limit_bytes=32 * 1024 * 1024,
        ),
        cost_estimate=cost,
    )(xs_p, h0_p, w_x, w_h, b)

    hiddens = slab[:T, :B, :H].astype(jnp.float32)
    log_probs = slab[:T, :B, h_pad:h_pad + O].astype(jnp.float32)
    return log_probs, hiddens


def rnn_forward(x, h, packed):
    """Single-step forward matching the PyTorch module's forward(input, hidden)."""
    log_probs, hiddens = rnn_sequence_forward(x[None], h, packed)
    return log_probs[0], hiddens[0]


# ----------------------------- pure-JAX reference -----------------------------

def rnn_sequence_ref(xs, h0, params):
    """Reference with the original (unpadded) parameters: bf16 MXU inputs,
    f32 accumulation, f32 carried hidden — matches the kernel's numerics."""
    w_i2h, b_i2h, w_i2o, b_i2o = params
    outs, hs = [], []
    h = h0.astype(jnp.float32)
    for t in range(xs.shape[0]):
        comb = jnp.concatenate([xs[t], h], axis=1).astype(jnp.bfloat16)
        new_h = jnp.dot(comb, w_i2h.astype(jnp.bfloat16),
                        preferred_element_type=jnp.float32) + b_i2h
        logits = jnp.dot(comb, w_i2o.astype(jnp.bfloat16),
                         preferred_element_type=jnp.float32) + b_i2o
        outs.append(jax.nn.log_softmax(logits, axis=1))
        hs.append(new_h)
        h = new_h
    return jnp.stack(outs), jnp.stack(hs)


if __name__ == "__main__":
    batch = 2
    seq_len = 16          # two T-blocks of 8 -> exercises the cross-block carry
    input_size = 16
    hidden_size = 32
    output_size = 16

    key = jax.random.PRNGKey(0)
    kp, kx = jax.random.split(key)
    params = init_params(kp, input_size, hidden_size, output_size)
    packed = pack_params(params, input_size)

    xs = jax.random.normal(kx, (seq_len, batch, input_size), jnp.float32)
    h0 = jnp.zeros((batch, hidden_size), jnp.float32)  # initHidden() broadcast over batch

    log_probs, hiddens = jax.block_until_ready(
        rnn_sequence_forward(xs, h0, packed, t_block=8))

    log_probs_ref, hiddens_ref = rnn_sequence_ref(xs, h0, params)
    assert log_probs.shape == (seq_len, batch, output_size)
    assert hiddens.shape == (seq_len, batch, hidden_size)
    assert bool(jnp.all(jnp.isfinite(log_probs)))
    assert jnp.allclose(log_probs, log_probs_ref, atol=3e-2, rtol=3e-2)
    assert jnp.allclose(hiddens, hiddens_ref, atol=3e-2, rtol=3e-2)

    # Single-step API (matches the PyTorch module's forward(input, hidden)).
    out1, h1 = jax.block_until_ready(rnn_forward(xs[0], h0, packed))
    assert jnp.allclose(out1, log_probs_ref[0], atol=3e-2, rtol=3e-2)
    assert jnp.allclose(h1, hiddens_ref[0], atol=3e-2, rtol=3e-2)

    print("KERNEL_OK")
</pallas_src>

<mosaic_0001>
module attributes {stable_mosaic.version = 11 : i64} {
  func.func @rnn_seq_kernel(%arg0: i32, %arg1: i32, %arg2: memref<8x8x128xbf16, #tpu.memory_space<vmem>>, %arg3: memref<8x128xf32, #tpu.memory_space<vmem>>, %arg4: memref<128x256xbf16, #tpu.memory_space<vmem>>, %arg5: memref<128x256xbf16, #tpu.memory_space<vmem>>, %arg6: memref<1x256xf32, #tpu.memory_space<vmem>>, %arg7: memref<8x8x256xbf16, #tpu.memory_space<vmem>>, %arg8: memref<8x128xf32, #tpu.memory_space<vmem>>) attributes {dimension_semantics = [#tpu.dimension_semantics<parallel>, #tpu.dimension_semantics<arbitrary>], iteration_bounds = array<i64: 1, 2>, scalar_prefetch = 0 : i64, scratch_operands = 1 : i64, tpu.core_type = #tpu.core_type<tc>, window_params = [{transform_indices = @transform_0, window_bounds = array<i64: 8, 8, 128>}, {transform_indices = @transform_1, window_bounds = array<i64: 8, 128>}, {pipeline_mode = #tpu.pipeline_mode<synchronous>, transform_indices = @transform_2, window_bounds = array<i64: 128, 256>}, {pipeline_mode = #tpu.pipeline_mode<synchronous>, transform_indices = @transform_3, window_bounds = array<i64: 128, 256>}, {pipeline_mode = #tpu.pipeline_mode<synchronous>, transform_indices = @transform_4, window_bounds = array<i64: 1, 256>}, {transform_indices = @transform_5, window_bounds = array<i64: 8, 8, 256>}]} {
    %c0_i32 = arith.constant 0 : i32
    %0 = arith.cmpi eq, %arg1, %c0_i32 : i32
    %1 = arith.extui %0 : i1 to i32
    %c0_i32_0 = arith.constant 0 : i32
    %2 = arith.cmpi ne, %1, %c0_i32_0 : i32
    scf.if %2 {
      %c0_62 = arith.constant 0 : index
      %c0_63 = arith.constant 0 : index
      %208 = vector.load %arg3[%c0_62, %c0_63] : memref<8x128xf32, #tpu.memory_space<vmem>>, vector<8x128xf32>
      %c0_64 = arith.constant 0 : index
      %c0_65 = arith.constant 0 : index
      %209 = vector.load %arg8[%c0_64, %c0_65] : memref<8x128xf32, #tpu.memory_space<vmem>>, vector<8x128xf32>
      tpu.vector_store %arg8[%c0_64, %c0_65], %208 {strides = array<i32>} : memref<8x128xf32, #tpu.memory_space<vmem>>, vector<8x128xf32>,
    } else {
    }
    %c0 = arith.constant 0 : index
    %c0_1 = arith.constant 0 : index
    %c0_2 = arith.constant 0 : index
    %3 = vector.load %arg2[%c0, %c0_1, %c0_2] : memref<8x8x128xbf16, #tpu.memory_space<vmem>>, vector<8x8x128xbf16>
    %4 = vector.shape_cast %3 : vector<8x8x128xbf16> to vector<64x128xbf16>
    %c0_3 = arith.constant 0 : index
    %c0_4 = arith.constant 0 : index
    %5 = vector.load %arg4[%c0_3, %c0_4] : memref<128x256xbf16, #tpu.memory_space<vmem>>, vector<128x256xbf16>
    %cst = arith.constant dense<0.000000e+00> : vector<64x256xf32>
    %6 = tpu.matmul %4, %5, %cst {dimension_numbers = #tpu.dot_dimension_numbers<[1], [0], [0], [1], [0, 0, 1, 1], [], []>} : vector<64x128xbf16>, vector<128x256xbf16>, vector<64x256xf32> -> vector<64x256xf32>
    %c0_5 = arith.constant 0 : index
    %c0_6 = arith.constant 0 : index
    %7 = vector.load %arg6[%c0_5, %c0_6] : memref<1x256xf32, #tpu.memory_space<vmem>>, vector<1x256xf32>
    %8 = vector.broadcast %7 : vector<1x256xf32> to vector<64x256xf32>
    %9 = arith.addf %6, %8 : vector<64x256xf32>
    %c0_7 = arith.constant 0 : index
    %c0_8 = arith.constant 0 : index
    %10 = vector.load %arg5[%c0_7, %c0_8] : memref<128x256xbf16, #tpu.memory_space<vmem>>, vector<128x256xbf16>
    %11 = tpu.iota {dimensions = array<i32: 1>} : vector<8x256xi32>
    %c128_i32 = arith.constant 128 : i32
    %12 = vector.broadcast %c128_i32 : i32 to vector<8x256xi32>
    %13 = arith.cmpi sge, %11, %12 : vector<8x256xi32>
    %c0_9 = arith.constant 0 : index
    %c0_10 = arith.constant 0 : index
    %14 = vector.load %arg8[%c0_9, %c0_10] : memref<8x128xf32, #tpu.memory_space<vmem>>, vector<8x128xf32>
    %15 = vector.extract_strided_slice %9 {offsets = [0, 0], sizes = [8, 256], strides = [1, 1]} : vector<64x256xf32> to vector<8x256xf32>
    %16 = arith.truncf %14 : vector<8x128xf32> to vector<8x128xbf16>
    %cst_11 = arith.constant dense<0.000000e+00> : vector<8x256xf32>
    %17 = tpu.matmul %16, %10, %cst_11 {dimension_numbers = #tpu.dot_dimension_numbers<[1], [0], [0], [1], [0, 0, 1, 1], [], []>} : vector<8x128xbf16>, vector<128x256xbf16>, vector<8x256xf32> -> vector<8x256xf32>
    %18 = arith.addf %15, %17 : vector<8x256xf32>
    %19 = vector.extract_strided_slice %18 {offsets = [0, 0], sizes = [8, 128], strides = [1, 1]} : vector<8x256xf32> to vector<8x128xf32>
    %20 = vector.extract_strided_slice %18 {offsets = [0, 128], sizes = [8, 128], strides = [1, 1]} : vector<8x256xf32> to vector<8x128xf32>
    %cst_12 = arith.constant dense<0xFF800000> : vector<8xf32>
    %21 = vector.multi_reduction <maximumf>, %20, %cst_12 [1] : vector<8x128xf32> to vector<8xf32>
    %22 = vector.shape_cast %21 : vector<8xf32> to vector<8x1xf32>
    %23 = vector.broadcast %22 : vector<8x1xf32> to vector<8x128xf32>
    %24 = arith.subf %20, %23 : vector<8x128xf32>
    %25 = math.exp %24 : vector<8x128xf32>
    %cst_13 = arith.constant dense<0.000000e+00> : vector<8xf32>
    %26 = vector.multi_reduction <add>, %25, %cst_13 [1] : vector<8x128xf32> to vector<8xf32>
    %27 = vector.shape_cast %26 : vector<8xf32> to vector<8x1xf32>
    %28 = math.log %27 : vector<8x1xf32>
    %29 = arith.addf %22, %28 : vector<8x1xf32>
    %cst_14 = arith.constant 0.000000e+00 : f32
    %30 = vector.shape_cast %29 : vector<8x1xf32> to vector<8x1xf32>
    %31 = vector.broadcast %30 : vector<8x1xf32> to vector<8x256xf32>
    %32 = vector.broadcast %cst_14 : f32 to vector<8x256xf32>
    %33 = arith.select %13, %31, %32 : vector<8x256xi1>, vector<8x256xf32>
    %34 = arith.subf %18, %33 : vector<8x256xf32>
    %35 = arith.truncf %34 : vector<8x256xf32> to vector<8x256xbf16>
    %c0_15 = arith.constant 0 : index
    %c0_16 = arith.constant 0 : index
    %c0_17 = arith.constant 0 : index
    %36 = vector.load %arg7[%c0_15, %c0_16, %c0_17] : memref<8x8x256xbf16, #tpu.memory_space<vmem>>, vector<1x8x256xbf16>
    %37 = vector.shape_cast %36 : vector<1x8x256xbf16> to vector<8x256xbf16>
    %38 = vector.shape_cast %35 : vector<8x256xbf16> to vector<1x8x256xbf16>
    tpu.vector_store %arg7[%c0_15, %c0_16, %c0_17], %38 {strides = array<i32>} : memref<8x8x256xbf16, #tpu.memory_space<vmem>>, vector<1x8x256xbf16>,
    %39 = vector.extract_strided_slice %9 {offsets = [8, 0], sizes = [8, 256], strides = [1, 1]} : vector<64x256xf32> to vector<8x256xf32>
    %40 = arith.truncf %19 : vector<8x128xf32> to vector<8x128xbf16>
    %cst_18 = arith.constant dense<0.000000e+00> : vector<8x256xf32>
    %41 = tpu.matmul %40, %10, %cst_18 {dimension_numbers = #tpu.dot_dimension_numbers<[1], [0], [0], [1], [0, 0, 1, 1], [], []>} : vector<8x128xbf16>, vector<128x256xbf16>, vector<8x256xf32> -> vector<8x256xf32>
    %42 = arith.addf %39, %41 : vector<8x256xf32>
    %43 = vector.extract_strided_slice %42 {offsets = [0, 0], sizes = [8, 128], strides = [1, 1]} : vector<8x256xf32> to vector<8x128xf32>
    %44 = vector.extract_strided_slice %42 {offsets = [0, 128], sizes = [8, 128], strides = [1, 1]} : vector<8x256xf32> to vector<8x128xf32>
    %cst_19 = arith.constant dense<0xFF800000> : vector<8xf32>
    %45 = vector.multi_reduction <maximumf>, %44, %cst_19 [1] : vector<8x128xf32> to vector<8xf32>
    %46 = vector.shape_cast %45 : vector<8xf32> to vector<8x1xf32>
    %47 = vector.broadcast %46 : vector<8x1xf32> to vector<8x128xf32>
    %48 = arith.subf %44, %47 : vector<8x128xf32>
    %49 = math.exp %48 : vector<8x128xf32>
    %cst_20 = arith.constant dense<0.000000e+00> : vector<8xf32>
    %50 = vector.multi_reduction <add>, %49, %cst_20 [1] : vector<8x128xf32> to vector<8xf32>
    %51 = vector.shape_cast %50 : vector<8xf32> to vector<8x1xf32>
    %52 = math.log %51 : vector<8x1xf32>
    %53 = arith.addf %46, %52 : vector<8x1xf32>
    %cst_21 = arith.constant 0.000000e+00 : f32
    %54 = vector.shape_cast %53 : vector<8x1xf32> to vector<8x1xf32>
    %55 = vector.broadcast %54 : vector<8x1xf32> to vector<8x256xf32>
    %56 = vector.broadcast %cst_21 : f32 to vector<8x256xf32>
    %57 = arith.select %13, %55, %56 : vector<8x256xi1>, vector<8x256xf32>
    %58 = arith.subf %42, %57 : vector<8x256xf32>
    %59 = arith.truncf %58 : vector<8x256xf32> to vector<8x256xbf16>
    %c1 = arith.constant 1 : index
    %c0_22 = arith.constant 0 : index
    %c0_23 = arith.constant 0 : index
    %60 = vector.load %arg7[%c1, %c0_22, %c0_23] : memref<8x8x256xbf16, #tpu.memory_space<vmem>>, vector<1x8x256xbf16>
    %61 = vector.shape_cast %60 : vector<1x8x256xbf16> to vector<8x256xbf16>
    %62 = vector.shape_cast %59 : vector<8x256xbf16> to vector<1x8x256xbf16>
    tpu.vector_store %arg7[%c1, %c0_22, %c0_23], %62 {strides = array<i32>} : memref<8x8x256xbf16, #tpu.memory_space<vmem>>, vector<1x8x256xbf16>,
    %63 = vector.extract_strided_slice %9 {offsets = [16, 0], sizes = [8, 256], strides = [1, 1]} : vector<64x256xf32> to vector<8x256xf32>
    %64 = arith.truncf %43 : vector<8x128xf32> to vector<8x128xbf16>
    %cst_24 = arith.constant dense<0.000000e+00> : vector<8x256xf32>
    %65 = tpu.matmul %64, %10, %cst_24 {dimension_numbers = #tpu.dot_dimension_numbers<[1], [0], [0], [1], [0, 0, 1, 1], [], []>} : vector<8x128xbf16>, vector<128x256xbf16>, vector<8x256xf32> -> vector<8x256xf32>
    %66 = arith.addf %63, %65 : vector<8x256xf32>
    %67 = vector.extract_strided_slice %66 {offsets = [0, 0], sizes = [8, 128], strides = [1, 1]} : vector<8x256xf32> to vector<8x128xf32>
    %68 = vector.extract_strided_slice %66 {offsets = [0, 128], sizes = [8, 128], strides = [1, 1]} : vector<8x256xf32> to vector<8x128xf32>
    %cst_25 = arith.constant dense<0xFF800000> : vector<8xf32>
    %69 = vector.multi_reduction <maximumf>, %68, %cst_25 [1] : vector<8x128xf32> to vector<8xf32>
    %70 = vector.shape_cast %69 : vector<8xf32> to vector<8x1xf32>
    %71 = vector.broadcast %70 : vector<8x1xf32> to vector<8x128xf32>
    %72 = arith.subf %68, %71 : vector<8x128xf32>
    %73 = math.exp %72 : vector<8x128xf32>
    %cst_26 = arith.constant dense<0.000000e+00> : vector<8xf32>
    %74 = vector.multi_reduction <add>, %73, %cst_26 [1] : vector<8x128xf32> to vector<8xf32>
    %75 = vector.shape_cast %74 : vector<8xf32> to vector<8x1xf32>
    %76 = math.log %75 : vector<8x1xf32>
    %77 = arith.addf %70, %76 : vector<8x1xf32>
    %cst_27 = arith.constant 0.000000e+00 : f32
    %78 = vector.shape_cast %77 : vector<8x1xf32> to vector<8x1xf32>
    %79 = vector.broadcast %78 : vector<8x1xf32> to vector<8x256xf32>
    %80 = vector.broadcast %cst_27 : f32 to vector<8x256xf32>
    %81 = arith.select %13, %79, %80 : vector<8x256xi1>, vector<8x256xf32>
    %82 = arith.subf %66, %81 : vector<8x256xf32>
    %83 = arith.truncf %82 : vector<8x256xf32> to vector<8x256xbf16>
    %c2 = arith.constant 2 : index
    %c0_28 = arith.constant 0 : index
    %c0_29 = arith.constant 0 : index
    %84 = vector.load %arg7[%c2, %c0_28, %c0_29] : memref<8x8x256xbf16, #tpu.memory_space<vmem>>, vector<1x8x256xbf16>
    %85 = vector.shape_cast %84 : vector<1x8x256xbf16> to vector<8x256xbf16>
    %86 = vector.shape_cast %83 : vector<8x256xbf16> to vector<1x8x256xbf16>
    tpu.vector_store %arg7[%c2, %c0_28, %c0_29], %86 {strides = array<i32>} : memref<8x8x256xbf16, #tpu.memory_space<vmem>>, vector<1x8x256xbf16>,
    %87 = vector.extract_strided_slice %9 {offsets = [24, 0], sizes = [8, 256], strides = [1, 1]} : vector<64x256xf32> to vector<8x256xf32>
    %88 = arith.truncf %67 : vector<8x128xf32> to vector<8x128xbf16>
    %cst_30 = arith.constant dense<0.000000e+00> : vector<8x256xf32>
    %89 = tpu.matmul %88, %10, %cst_30 {dimension_numbers = #tpu.dot_dimension_numbers<[1], [0], [0], [1], [0, 0, 1, 1], [], []>} : vector<8x128xbf16>, vector<128x256xbf16>, vector<8x256xf32> -> vector<8x256xf32>
    %90 = arith.addf %87, %89 : vector<8x256xf32>
    %91 = vector.extract_strided_slice %90 {offsets = [0, 0], sizes = [8, 128], strides = [1, 1]} : vector<8x256xf32> to vector<8x128xf32>
    %92 = vector.extract_strided_slice %90 {offsets = [0, 128], sizes = [8, 128], strides = [1, 1]} : vector<8x256xf32> to vector<8x128xf32>
    %cst_31 = arith.constant dense<0xFF800000> : vector<8xf32>
    %93 = vector.multi_reduction <maximumf>, %92, %cst_31 [1] : vector<8x128xf32> to vector<8xf32>
    %94 = vector.shape_cast %93 : vector<8xf32> to vector<8x1xf32>
    %95 = vector.broadcast %94 : vector<8x1xf32> to vector<8x128xf32>
    %96 = arith.subf %92, %95 : vector<8x128xf32>
    %97 = math.exp %96 : vector<8x128xf32>
    %cst_32 = arith.constant dense<0.000000e+00> : vector<8xf32>
    %98 = vector.multi_reduction <add>, %97, %cst_32 [1] : vector<8x128xf32> to vector<8xf32>
    %99 = vector.shape_cast %98 : vector<8xf32> to vector<8x1xf32>
    %100 = math.log %99 : vector<8x1xf32>
    %101 = arith.addf %94, %100 : vector<8x1xf32>
    %cst_33 = arith.constant 0.000000e+00 : f32
    %102 = vector.shape_cast %101 : vector<8x1xf32> to vector<8x1xf32>
    %103 = vector.broadcast %102 : vector<8x1xf32> to vector<8x256xf32>
    %104 = vector.broadcast %cst_33 : f32 to vector<8x256xf32>
    %105 = arith.select %13, %103, %104 : vector<8x256xi1>, vector<8x256xf32>
    %106 = arith.subf %90, %105 : vector<8x256xf32>
    %107 = arith.truncf %106 : vector<8x256xf32> to vector<8x256xbf16>
    %c3 = arith.constant 3 : index
    %c0_34 = arith.constant 0 : index
    %c0_35 = arith.constant 0 : index
    %108 = vector.load %arg7[%c3, %c0_34, %c0_35] : memref<8x8x256xbf16, #tpu.memory_space<vmem>>, vector<1x8x256xbf16>
    %109 = vector.shape_cast %108 : vector<1x8x256xbf16> to vector<8x256xbf16>
    %110 = vector.shape_cast %107 : vector<8x256xbf16> to vector<1x8x256xbf16>
    tpu.vector_store %arg7[%c3, %c0_34, %c0_35], %110 {strides = array<i32>} : memref<8x8x256xbf16, #tpu.memory_space<vmem>>, vector<1x8x256xbf16>,
    %111 = vector.extract_strided_slice %9 {offsets = [32, 0], sizes = [8, 256], strides = [1, 1]} : vector<64x256xf32> to vector<8x256xf32>
    %112 = arith.truncf %91 : vector<8x128xf32> to vector<8x128xbf16>
    %cst_36 = arith.constant dense<0.000000e+00> : vector<8x256xf32>
    %113 = tpu.matmul %112, %10, %cst_36 {dimension_numbers = #tpu.dot_dimension_numbers<[1], [0], [0], [1], [0, 0, 1, 1], [], []>} : vector<8x128xbf16>, vector<128x256xbf16>, vector<8x256xf32> -> vector<8x256xf32>
    %114 = arith.addf %111, %113 : vector<8x256xf32>
    %115 = vector.extract_strided_slice %114 {offsets = [0, 0], sizes = [8, 128], strides = [1, 1]} : vector<8x256xf32> to vector<8x128xf32>
    %116 = vector.extract_strided_slice %114 {offsets = [0, 128], sizes = [8, 128], strides = [1, 1]} : vector<8x256xf32> to vector<8x128xf32>
    %cst_37 = arith.constant dense<0xFF800000> : vector<8xf32>
    %117 = vector.multi_reduction <maximumf>, %116, %cst_37 [1] : vector<8x128xf32> to vector<8xf32>
    %118 = vector.shape_cast %117 : vector<8xf32> to vector<8x1xf32>
    %119 = vector.broadcast %118 : vector<8x1xf32> to vector<8x128xf32>
    %120 = arith.subf %116, %119 : vector<8x128xf32>
    %121 = math.exp %120 : vector<8x128xf32>
    %cst_38 = arith.constant dense<0.000000e+00> : vector<8xf32>
    %122 = vector.multi_reduction <add>, %121, %cst_38 [1] : vector<8x128xf32> to vector<8xf32>
    %123 = vector.shape_cast %122 : vector<8xf32> to vector<8x1xf32>
    %124 = math.log %123 : vector<8x1xf32>
    %125 = arith.addf %118, %124 : vector<8x1xf32>
    %cst_39 = arith.constant 0.000000e+00 : f32
    %126 = vector.shape_cast %125 : vector<8x1xf32> to vector<8x1xf32>
    %127 = vector.broadcast %126 : vector<8x1xf32> to vector<8x256xf32>
    %128 = vector.broadcast %cst_39 : f32 to vector<8x256xf32>
    %129 = arith.select %13, %127, %128 : vector<8x256xi1>, vector<8x256xf32>
    %130 = arith.subf %114, %129 : vector<8x256xf32>
    %131 = arith.truncf %130 : vector<8x256xf32> to vector<8x256xbf16>
    %c4 = arith.constant 4 : index
    %c0_40 = arith.constant 0 : index
    %c0_41 = arith.constant 0 : index
    %132 = vector.load %arg7[%c4, %c0_40, %c0_41] : memref<8x8x256xbf16, #tpu.memory_space<vmem>>, vector<1x8x256xbf16>
    %133 = vector.shape_cast %132 : vector<1x8x256xbf16> to vector<8x256xbf16>
    %134 = vector.shape_cast %131 : vector<8x256xbf16> to vector<1x8x256xbf16>
    tpu.vector_store %arg7[%c4, %c0_40, %c0_41], %134 {strides = array<i32>} : memref<8x8x256xbf16, #tpu.memory_space<vmem>>, vector<1x8x256xbf16>,
    %135 = vector.extract_strided_slice %9 {offsets = [40, 0], sizes = [8, 256], strides = [1, 1]} : vector<64x256xf32> to vector<8x256xf32>
    %136 = arith.truncf %115 : vector<8x128xf32> to vector<8x128xbf16>
    %cst_42 = arith.constant dense<0.000000e+00> : vector<8x256xf32>
    %137 = tpu.matmul %136, %10, %cst_42 {dimension_numbers = #tpu.dot_dimension_numbers<[1], [0], [0], [1], [0, 0, 1, 1], [], []>} : vector<8x128xbf16>, vector<128x256xbf16>, vector<8x256xf32> -> vector<8x256xf32>
    %138 = arith.addf %135, %137 : vector<8x256xf32>
    %139 = vector.extract_strided_slice %138 {offsets = [0, 0], sizes = [8, 128], strides = [1, 1]} : vector<8x256xf32> to vector<8x128xf32>
    %140 = vector.extract_strided_slice %138 {offsets = [0, 128], sizes = [8, 128], strides = [1, 1]} : vector<8x256xf32> to vector<8x128xf32>
    %cst_43 = arith.constant dense<0xFF800000> : vector<8xf32>
    %141 = vector.multi_reduction <maximumf>, %140, %cst_43 [1] : vector<8x128xf32> to vector<8xf32>
    %142 = vector.shape_cast %141 : vector<8xf32> to vector<8x1xf32>
    %143 = vector.broadcast %142 : vector<8x1xf32> to vector<8x128xf32>
    %144 = arith.subf %140, %143 : vector<8x128xf32>
    %145 = math.exp %144 : vector<8x128xf32>
    %cst_44 = arith.constant dense<0.000000e+00> : vector<8xf32>
    %146 = vector.multi_reduction <add>, %145, %cst_44 [1] : vector<8x128xf32> to vector<8xf32>
    %147 = vector.shape_cast %146 : vector<8xf32> to vector<8x1xf32>
    %148 = math.log %147 : vector<8x1xf32>
    %149 = arith.addf %142, %148 : vector<8x1xf32>
    %cst_45 = arith.constant 0.000000e+00 : f32
    %150 = vector.shape_cast %149 : vector<8x1xf32> to vector<8x1xf32>
    %151 = vector.broadcast %150 : vector<8x1xf32> to vector<8x256xf32>
    %152 = vector.broadcast %cst_45 : f32 to vector<8x256xf32>
    %153 = arith.select %13, %151, %152 : vector<8x256xi1>, vector<8x256xf32>
    %154 = arith.subf %138, %153 : vector<8x256xf32>
    %155 = arith.truncf %154 : vector<8x256xf32> to vector<8x256xbf16>
    %c5 = arith.constant 5 : index
    %c0_46 = arith.constant 0 : index
    %c0_47 = arith.constant 0 : index
    %156 = vector.load %arg7[%c5, %c0_46, %c0_47] : memref<8x8x256xbf16, #tpu.memory_space<vmem>>, vector<1x8x256xbf16>
    %157 = vector.shape_cast %156 : vector<1x8x256xbf16> to vector<8x256xbf16>
    %158 = vector.shape_cast %155 : vector<8x256xbf16> to vector<1x8x256xbf16>
    tpu.vector_store %arg7[%c5, %c0_46, %c0_47], %158 {strides = array<i32>} : memref<8x8x256xbf16, #tpu.memory_space<vmem>>, vector<1x8x256xbf16>,
    %159 = vector.extract_strided_slice %9 {offsets = [48, 0], sizes = [8, 256], strides = [1, 1]} : vector<64x256xf32> to vector<8x256xf32>
    %160 = arith.truncf %139 : vector<8x128xf32> to vector<8x128xbf16>
    %cst_48 = arith.constant dense<0.000000e+00> : vector<8x256xf32>
    %161 = tpu.matmul %160, %10, %cst_48 {dimension_numbers = #tpu.dot_dimension_numbers<[1], [0], [0], [1], [0, 0, 1, 1], [], []>} : vector<8x128xbf16>, vector<128x256xbf16>, vector<8x256xf32> -> vector<8x256xf32>
    %162 = arith.addf %159, %161 : vector<8x256xf32>
    %163 = vector.extract_strided_slice %162 {offsets = [0, 0], sizes = [8, 128], strides = [1, 1]} : vector<8x256xf32> to vector<8x128xf32>
    %164 = vector.extract_strided_slice %162 {offsets = [0, 128], sizes = [8, 128], strides = [1, 1]} : vector<8x256xf32> to vector<8x128xf32>
    %cst_49 = arith.constant dense<0xFF800000> : vector<8xf32>
    %165 = vector.multi_reduction <maximumf>, %164, %cst_49 [1] : vector<8x128xf32> to vector<8xf32>
    %166 = vector.shape_cast %165 : vector<8xf32> to vector<8x1xf32>
    %167 = vector.broadcast %166 : vector<8x1xf32> to vector<8x128xf32>
    %168 = arith.subf %164, %167 : vector<8x128xf32>
    %169 = math.exp %168 : vector<8x128xf32>
    %cst_50 = arith.constant dense<0.000000e+00> : vector<8xf32>
    %170 = vector.multi_reduction <add>, %169, %cst_50 [1] : vector<8x128xf32> to vector<8xf32>
    %171 = vector.shape_cast %170 : vector<8xf32> to vector<8x1xf32>
    %172 = math.log %171 : vector<8x1xf32>
    %173 = arith.addf %166, %172 : vector<8x1xf32>
    %cst_51 = arith.constant 0.000000e+00 : f32
    %174 = vector.shape_cast %173 : vector<8x1xf32> to vector<8x1xf32>
    %175 = vector.broadcast %174 : vector<8x1xf32> to vector<8x256xf32>
    %176 = vector.broadcast %cst_51 : f32 to vector<8x256xf32>
    %177 = arith.select %13, %175, %176 : vector<8x256xi1>, vector<8x256xf32>
    %178 = arith.subf %162, %177 : vector<8x256xf32>
    %179 = arith.truncf %178 : vector<8x256xf32> to vector<8x256xbf16>
    %c6 = arith.constant 6 : index
    %c0_52 = arith.constant 0 : index
    %c0_53 = arith.constant 0 : index
    %180 = vector.load %arg7[%c6, %c0_52, %c0_53] : memref<8x8x256xbf16, #tpu.memory_space<vmem>>, vector<1x8x256xbf16>
    %181 = vector.shape_cast %180 : vector<1x8x256xbf16> to vector<8x256xbf16>
    %182 = vector.shape_cast %179 : vector<8x256xbf16> to vector<1x8x256xbf16>
    tpu.vector_store %arg7[%c6, %c0_52, %c0_53], %182 {strides = array<i32>} : memref<8x8x256xbf16, #tpu.memory_space<vmem>>, vector<1x8x256xbf16>,
    %183 = vector.extract_strided_slice %9 {offsets = [56, 0], sizes = [8, 256], strides = [1, 1]} : vector<64x256xf32> to vector<8x256xf32>
    %184 = arith.truncf %163 : vector<8x128xf32> to vector<8x128xbf16>
    %cst_54 = arith.constant dense<0.000000e+00> : vector<8x256xf32>
    %185 = tpu.matmul %184, %10, %cst_54 {dimension_numbers = #tpu.dot_dimension_numbers<[1], [0], [0], [1], [0, 0, 1, 1], [], []>} : vector<8x128xbf16>, vector<128x256xbf16>, vector<8x256xf32> -> vector<8x256xf32>
    %186 = arith.addf %183, %185 : vector<8x256xf32>
    %187 = vector.extract_strided_slice %186 {offsets = [0, 0], sizes = [8, 128], strides = [1, 1]} : vector<8x256xf32> to vector<8x128xf32>
    %188 = vector.extract_strided_slice %186 {offsets = [0, 128], sizes = [8, 128], strides = [1, 1]} : vector<8x256xf32> to vector<8x128xf32>
    %cst_55 = arith.constant dense<0xFF800000> : vector<8xf32>
    %189 = vector.multi_reduction <maximumf>, %188, %cst_55 [1] : vector<8x128xf32> to vector<8xf32>
    %190 = vector.shape_cast %189 : vector<8xf32> to vector<8x1xf32>
    %191 = vector.broadcast %190 : vector<8x1xf32> to vector<8x128xf32>
    %192 = arith.subf %188, %191 : vector<8x128xf32>
    %193 = math.exp %192 : vector<8x128xf32>
    %cst_56 = arith.constant dense<0.000000e+00> : vector<8xf32>
    %194 = vector.multi_reduction <add>, %193, %cst_56 [1] : vector<8x128xf32> to vector<8xf32>
    %195 = vector.shape_cast %194 : vector<8xf32> to vector<8x1xf32>
    %196 = math.log %195 : vector<8x1xf32>
    %197 = arith.addf %190, %196 : vector<8x1xf32>
    %cst_57 = arith.constant 0.000000e+00 : f32
    %198 = vector.shape_cast %197 : vector<8x1xf32> to vector<8x1xf32>
    %199 = vector.broadcast %198 : vector<8x1xf32> to vector<8x256xf32>
    %200 = vector.broadcast %cst_57 : f32 to vector<8x256xf32>
    %201 = arith.select %13, %199, %200 : vector<8x256xi1>, vector<8x256xf32>
    %202 = arith.subf %186, %201 : vector<8x256xf32>
    %203 = arith.truncf %202 : vector<8x256xf32> to vector<8x256xbf16>
    %c7 = arith.constant 7 : index
    %c0_58 = arith.constant 0 : index
    %c0_59 = arith.constant 0 : index
    %204 = vector.load %arg7[%c7, %c0_58, %c0_59] : memref<8x8x256xbf16, #tpu.memory_space<vmem>>, vector<1x8x256xbf16>
    %205 = vector.shape_cast %204 : vector<1x8x256xbf16> to vector<8x256xbf16>
    %206 = vector.shape_cast %203 : vector<8x256xbf16> to vector<1x8x256xbf16>
    tpu.vector_store %arg7[%c7, %c0_58, %c0_59], %206 {strides = array<i32>} : memref<8x8x256xbf16, #tpu.memory_space<vmem>>, vector<1x8x256xbf16>,
    %c0_60 = arith.constant 0 : index
    %c0_61 = arith.constant 0 : index
    %207 = vector.load %arg8[%c0_60, %c0_61] : memref<8x128xf32, #tpu.memory_space<vmem>>, vector<8x128xf32>
    tpu.vector_store %arg8[%c0_60, %c0_61], %187 {strides = array<i32>} : memref<8x128xf32, #tpu.memory_space<vmem>>, vector<8x128xf32>,
    return
  }
  func.func @transform_0(%arg0: i32, %arg1: i32) -> (i32, i32, i32) {
    %c0_i32 = arith.constant 0 : i32
    %c0_i32_0 = arith.constant 0 : i32
    return %arg1, %arg0, %c0_i32 : i32, i32, i32
  }
  func.func @transform_1(%arg0: i32, %arg1: i32) -> (i32, i32) {
    %c0_i32 = arith.constant 0 : i32
    %c0_i32_0 = arith.constant 0 : i32
    return %arg0, %c0_i32 : i32, i32
  }
  func.func @transform_2(%arg0: i32, %arg1: i32) -> (i32, i32) {
    %c0_i32 = arith.constant 0 : i32
    %c0_i32_0 = arith.constant 0 : i32
    %c0_i32_1 = arith.constant 0 : i32
    return %c0_i32, %c0_i32_0 : i32, i32
  }
  func.func @transform_3(%arg0: i32, %arg1: i32) -> (i32, i32) {
    %c0_i32 = arith.constant 0 : i32
    %c0_i32_0 = arith.constant 0 : i32
    %c0_i32_1 = arith.constant 0 : i32
    return %c0_i32, %c0_i32_0 : i32, i32
  }
  func.func @transform_4(%arg0: i32, %arg1: i32) -> (i32, i32) {
    %c0_i32 = arith.constant 0 : i32
    %c0_i32_0 = arith.constant 0 : i32
    %c0_i32_1 = arith.constant 0 : i32
    return %c0_i32, %c0_i32_0 : i32, i32
  }
  func.func @transform_5(%arg0: i32, %arg1: i32) -> (i32, i32, i32) {
    %c0_i32 = arith.constant 0 : i32
    %c0_i32_0 = arith.constant 0 : i32
    return %arg1, %arg0, %c0_i32 : i32, i32, i32
  }
}

</mosaic_0001>

<bundles_post_ra>
// kernel: tpu_custom_call.1
= control target key start
LH: loop header
LB: loop body
LE: loop exit
PB: predicated region body
PF: predicated region fallthrough
CT: control target
= control target key end

     0   :  { %s2399_s0 = inlined_call_operand.hbm [shape: bf16[16,8,128], index: 0, kind: input, shape index: {}]   ;;  %s2400_s1 = inlined_call_operand.hbm [shape: f32[8,128], index: 1, kind: input, shape index: {}]   ;;  %s2401_s2 = inlined_call_operand.hbm [shape: bf16[128,256], index: 2, kind: input, shape index: {}]   ;;  %s2402_s3 = inlined_call_operand.hbm [shape: bf16[128,256], index: 3, kind: input, shape index: {}]   ;;  %s2403_s4 = inlined_call_operand.vmem [shape: f32[1,256], index: 4, kind: input, shape index: {}]   ;;  %s2404_s5 = inlined_call_operand.hbm [shape: bf16[16,8,256], index: 5, kind: output, shape index: {}]  }
   0x1   :  { %2409 = sst [smem:[#allocation16_spill]] %s2400_s1 }
   0x2   :  { %10 = vsyncpa [#allocation4], 0 }
   0x3   :  { %12 = vsyncpa [#allocation4 + $0x1], 0 }
   0x4   :  { %13 = vsyncpa [#allocation7], 0 }
   0x5   :  { %14 = vsyncpa [#allocation10], 0 }
   0x6   :  { %15 = vsyncpa [#allocation5], 0 }
   0x7   :  { %17 = vsyncpa [#allocation5 + $0x1], 0  ;;  %s1828_s18 = smov 0   ;;  %s1830_s19 = smov 0  }
   0x8   :  { %s1832_s20 = smov 0   ;;  %s1834_s21 = smov 0  }
   0x9   :  { %s1836_s22 = smov 0   ;;  %s1838_s23 = smov 0  }
   0xa LB: > { %s1311_s24 = sadd.s32 4294967295, %s1784_s23   ;;  %s1312_s25 = sadd.s32 4294967294, %s1784_s23   ;;  %s1784_s23 = sphi %s1838_s23, %s23_s23   ;;  %s1780_s22 = sphi %s1836_s22, %s2430_s22   ;;  %s1776_s21 = sphi %s1834_s21, %s2429_s21   ;;  %s1772_s20 = sphi %s1832_s20, %s2428_s20   ;;  %s1768_s19 = sphi %s1830_s19, %s2427_s19   ;;  %s1764_s18 = sphi %s1828_s18, %s2426_s18  }
   0xb   : > { %p57_p0 = scmp.ne.s32.totalorder %s1768_s19, %s1764_s18  ;;  %p1862_p1 = scmp.eq.s32.totalorder %s1311_s24, 0 }
   0xc   : > { %p1866_p2 = scmp.eq.s32.totalorder %s1311_s24, 1  ;;  %p178_p3 = scmp.eq.s32.totalorder %s1312_s25, 1 }
   0xd   : > { %s2410_s26 = scalar_select %p1862_p1, 1, 0 }
   0xe   : > { %s2411_s27 = scalar_select %p1866_p2, 1, 0 }
   0xf   : > { %p1872_p4 = por %p1862_p1, %p57_p0  ;;  %p1313_p5 = scmp.ge.s32.totalorder %s1784_s23, 1 }
  0x10   : > { %p1877_p6 = por %p178_p3, %p57_p0  ;;  %p185_p7 = scmp.lt.s32.totalorder %s1784_s23, 3 }
  0x11   : > { %s2412_s28 = scalar_select %p1872_p4, 1, 0 }
  0x12   : > { %s2413_s29 = scalar_select %p1877_p6, 1, 0 }
  0x13   : > { %p1882_p8 = pnand %p1313_p5, %p185_p7  ;;  %s1786_s6 = smov [#allocation6]  }
  0x14   : > { %s200_s7 = sshll.u32 %s1786_s6, 4  ;;  %s1787_s8 = smov [#allocation8]   ;;  %s201_s7 = int_to_ptr.vmem [resolvable:$true] %s200_s7 }
  0x15   : > { %s2414_s30 = scalar_select %p1882_p8, 1, 0 }
  0x16   : > { %p1412_p10 = pneg %p1882_p8  ;;  %s210_s9 = sshll.u32 %s1787_s8, 4  ;;  %s1895_s9 = int_to_ptr.vmem [resolvable:$true] %s210_s9 }
  0x17   : > { %s1788_s11 = smov [#allocation9]   ;;  %s2416_s1 = sld [smem:[#allocation16_spill]] }
  0x18   : > { %p1891_p11 = pnand %p1412_p10, %p1862_p1  ;;  %s1897_s12 = sshll.u32 %s1788_s11, 4  ;;  %s224_s12 = int_to_ptr.vmem [resolvable:$true] %s1897_s12 }
  0x1a   : > { %p1907_p13 = pneg %p1891_p11 }
  0x1d   : > { %s1580_s15 = scalar_lea.hbm %s2416_s1, 128 }
  0x1e   : > { %p1581_p12 = scmp.ne.s32.totalorder %s2416_s1, %s1580_s15  ;;  %p1587_p5 = scmp.lt.u32.totalorder %s1580_s15, %s2416_s1 }
  0x20   : > { %p1583_p0 = pnand %p1907_p13, %p1581_p12 }
  0x22   : > { %p1584_p3 = pneg %p1583_p0 }
  0x24   : > { %p1589_p7 = pnand %p1587_p5, %p1584_p3 }
  0x26   : > { %1592 = shalt.err (!%p1589_p7)
}
  0x27   : > { %s1593_s8 = scalar_lea.vmem %s201_s7, 128  ;;  %p1601_p1 = scmp.lt.s32.totalorder %s201_s7, %s201_s7 }
  0x28   : > { %p1594_p10 = scmp.ne.s32.totalorder %s201_s7, %s1593_s8  ;;  %p1602_p4 = scmp.lt.s32.totalorder %s1593_s8, %s1593_s8 }
  0x2a   : > { %p1596_p9 = pnand %p1594_p10, %p1907_p13  ;;  %p1603_p8 = por %p1602_p4, %p1601_p1 }
  0x2c   : > { %p1597_p6 = pneg %p1596_p9 }
  0x2e   : > { %p1604_p2 = pnand %p1603_p8, %p1597_p6 }
  0x30   : > { %1607 = shalt.err (!%p1604_p2)
}
  0x31   : > { %1415 = dma.hbm_to_vmem [thread:$0]  (!%p1891_p11), %s2416_s1, 128, %s201_s7, [#allocation7]  }
  0x32   : > { %s1608_s16 = scalar_lea.hbm %s2401_s2, 2048 }
  0x33   : > { %p1609_p9 = scmp.ne.s32.totalorder %s2401_s2, %s1608_s16  ;;  %p1615_p2 = scmp.lt.u32.totalorder %s1608_s16, %s2401_s2 }
  0x35   : > { %p1611_p12 = pnand %p1609_p9, %p1907_p13 }
  0x37   : > { %p1612_p1 = pneg %p1611_p12 }
  0x39   : > { %p1617_p4 = pnand %p1615_p2, %p1612_p1 }
  0x3b   : > { %1620 = shalt.err (!%p1617_p4)
}
  0x3c   : > { %s1621_s7 = scalar_lea.vmem %s1895_s9, 2048  ;;  %p1629_p3 = scmp.lt.s32.totalorder %s1895_s9, %s1895_s9 }
  0x3d   : > { %p1622_p6 = scmp.ne.s32.totalorder %s1895_s9, %s1621_s7  ;;  %p1630_p5 = scmp.lt.s32.totalorder %s1621_s7, %s1621_s7 }
  0x3f   : > { %p1624_p8 = pnand %p1622_p6, %p1907_p13  ;;  %p1631_p7 = por %p1630_p5, %p1629_p3 }
  0x41   : > { %p1625_p0 = pneg %p1624_p8 }
  0x43   : > { %p1632_p10 = pnand %p1631_p7, %p1625_p0 }
  0x45   : > { %1635 = shalt.err (!%p1632_p10)
}
  0x46   : > { %s1789_s11 = smov 128   ;;  %s1790_s13 = smov 8  }
  0x47   : > { %1418 = dma.hbm_to_vmem [thread:$0]  (!%p1891_p11), %s2401_s2, 2048, %s1895_s9, [#allocation7], %s1789_s11, %s1789_s11, %s1790_s13  }
  0x48   : > { %s1636_s25 = scalar_lea.hbm %s2402_s3, 2048 }
  0x49   : > { %p1637_p9 = scmp.ne.s32.totalorder %s2402_s3, %s1636_s25  ;;  %p1643_p2 = scmp.lt.u32.totalorder %s1636_s25, %s2402_s3 }
  0x4b   : > { %p1639_p12 = pnand %p1637_p9, %p1907_p13 }
  0x4d   : > { %p1640_p1 = pneg %p1639_p12 }
  0x4f   : > { %p1645_p4 = pnand %p1643_p2, %p1640_p1 }
  0x51   : > { %1648 = shalt.err (!%p1645_p4)
}
  0x52   : > { %s1649_s14 = scalar_lea.vmem %s224_s12, 2048  ;;  %p1657_p3 = scmp.lt.s32.totalorder %s224_s12, %s224_s12 }
  0x53   : > { %p1650_p6 = scmp.ne.s32.totalorder %s224_s12, %s1649_s14  ;;  %p1658_p5 = scmp.lt.s32.totalorder %s1649_s14, %s1649_s14 }
  0x55   : > { %p1652_p8 = pnand %p1650_p6, %p1907_p13  ;;  %p1659_p7 = por %p1658_p5, %p1657_p3 }
  0x57   : > { %p1653_p0 = pneg %p1652_p8 }
  0x59   : > { %p1660_p10 = pnand %p1659_p7, %p1653_p0 }
  0x5b   : > { %1663 = shalt.err (!%p1660_p10)
}
  0x5c   : > { %1421 = dma.hbm_to_vmem [thread:$0]  (!%p1891_p11), %s2402_s3, 2048, %s224_s12, [#allocation10], %s1789_s11, %s1789_s11, %s1790_s13  }
  0x5d   : > { %s44_s1 = sadd.s32 1, %s1772_s20  ;;  %s32_s24 = sadd.s32 1, %s1780_s22 }
  0x5e   : > { %p51_p13 = scmp.ne.s32.totalorder %s1772_s20, %s1768_s19  ;;  %p33_p9 = scmp.ge.s32.totalorder %s32_s24, 2 }
  0x5f   : > { %p52_p12 = scmp.eq.s32.totalorder %s1784_s23, 0  ;;  %p2418_p1 = scmp.ne.s32.totalorder %s2411_s27, 0 }
  0x60   : > { %p1433_p4 = scmp.lt.s32.totalorder %s1784_s23, 2  ;;  %s2432_s24 = smov (%p33_p9, %s32_s24), 0 }
  0x61   : > { %p1972_p2 = por %p2418_p1, %p51_p13  ;;  %p53_p6 = por %p52_p12, %p51_p13 }
  0x62   : > { %s240_s16 = sand.u32 1, %s1772_s20   ;;  %s39_s17 = ssub.s32 %s1780_s22, %s2432_s24 }
  0x63   : > { %p42_p8 = scmp.eq.s32.totalorder %s39_s17, 0  ;;  %s1318_s12 = sshll.u32 %s240_s16, 5 }
  0x64   : > { %s1385_s11 = sshll.u32 %s1780_s22, 9  ;;  %s244_s8 = scalar_lea.vmem [#allocation3], %s1318_s12 }
  0x65   : > { %s1984_s13 = scalar_select %p42_p8, %s1772_s20, %s44_s1  }
  0x66   : > { %s1989_s27 = scalar_lea.hbm %s2399_s0, %s1385_s11  ;;  %s252_s7 = sshll.u32 %s244_s8, 4  ;;  %s1991_s7 = int_to_ptr.vmem [resolvable:$true] %s252_s7 }
  0x67   : > { %p1995_p11 = pnand %p1433_p4, %p53_p6  ;;  %s1999_s9 = scalar_lea.sflag [#allocation4], %s240_s16 }
  0x68   : > { %s1664_s15 = scalar_lea.hbm %s1989_s27, 512  ;;  %s1669_s12 = scalar_lea.hbm %s2399_s0, 1024 }
  0x69   : > { %p1665_p0 = scmp.ne.s32.totalorder %s1989_s27, %s1664_s15  ;;  %p1666_p3 = pneg %p1995_p11 }
  0x6a   : > { %p1670_p10 = scmp.lt.u32.totalorder %s1989_s27, %s2399_s0  ;;  %p1671_p13 = scmp.lt.u32.totalorder %s1669_s12, %s1664_s15 }
  0x6b   : > { %p1667_p5 = pnand %p1666_p3, %p1665_p0  ;;  %p1673_p12 = scmp.lt.u32.totalorder %s1664_s15, %s1989_s27 }
  0x6c   : > { %p1672_p9 = por %p1671_p13, %p1670_p10 }
  0x6d   : > { %p1668_p7 = pneg %p1667_p5 }
  0x6e   : > { %p1674_p1 = por %p1673_p12, %p1672_p9 }
  0x70   : > { %p1675_p4 = pnand %p1674_p1, %p1668_p7 }
  0x72   : > { %1678 = shalt.err (!%p1675_p4)
}
  0x73   : > { %s1679_s16 = scalar_lea.vmem %s1991_s7, 512  ;;  %s1791_s6 = smov [#allocation3]  }
  0x74   : > { %p1680_p6 = scmp.ne.s32.totalorder %s1991_s7, %s1679_s16  ;;  %s1684_s8 = sshll.u32 %s1791_s6, 4  ;;  %s1685_s8 = int_to_ptr.vmem [resolvable:$false] %s1684_s8 }
  0x75   : > { %s1686_s1 = scalar_lea.vmem %s1685_s8, 1024  ;;  %p1687_p5 = scmp.lt.s32.totalorder %s1991_s7, %s1685_s8 }
  0x76   : > { %p1682_p8 = pnand %p1680_p6, %p1666_p3  ;;  %p1688_p10 = scmp.lt.s32.totalorder %s1686_s1, %s1679_s16 }
  0x78   : > { %p1683_p0 = pneg %p1682_p8  ;;  %p1689_p13 = por %p1688_p10, %p1687_p5 }
  0x7a   : > { %p1690_p9 = pnand %p1689_p13, %p1683_p0 }
  0x7c   : > { %1693 = shalt.err (!%p1690_p9)
}
  0x7d   : > { %s1792_s15 = smov 64   ;;  %s1793_s17 = smov 4  }
  0x7e   : > { %1425 = dma.hbm_to_vmem [thread:$0]  (!%p1995_p11), %s1989_s27, 512, %s1991_s7, %s1999_s9, %s1792_s15, %s1792_s15, %s1793_s17  }
  0x7f   : > { %p2421_p3 = scmp.ne.s32.totalorder %s2414_s30, 0 }
  0x80   : > { %s2030_s12 = sand.u32 (!%p2421_p3), 1, %s1768_s19   ;;  %p2422_p7 = scmp.ne.s32.totalorder (!%p2421_p3), %s2412_s28, 0 }
  0x81   : > { %264 = sbr.rel (%p2421_p3) target bundleno = 2247 (0x8c7), region = 40  ;;  %s1322_s11 = sshll.u32 (!%p2421_p3), %s2030_s12, 5 }
  0x82   : > { %s267_s25 = scalar_lea.sflag (!%p2421_p3), [#allocation4], %s2030_s12  ;;  %s2034_s16 = scalar_lea.vmem (!%p2421_p3), [#allocation3], %s1322_s11 }
  0x88   : > { %1747 = dma.done.wait (%p2422_p7), %s267_s25, 512  }
  0x89   : > { %1749 = vsyncadd (%p2422_p7), %s267_s25, 4294966784  ;;  %p2423_p11 = scmp.ne.s32.totalorder %s2410_s26, 0 }
  0x8b   : > { %1751 = dma.done.wait (%p2423_p11), [#allocation7], 2176  }
  0x8c   : > { %1753 = vsyncadd (%p2423_p11), [#allocation7], 4294965120 }
  0x8d   : > { %1755 = dma.done.wait (%p2423_p11), [#allocation10], 2048  }
  0x8e   : > { %1757 = vsyncadd (%p2423_p11), [#allocation10], 4294965248  ;;  %s1326_s30 = sshll.u32 %s2030_s12, 6  ;;  %p1327_p12 = scmp.ne.s32.totalorder %s1776_s21, 0 }
  0x8f   : > { %s2049_s27 = scalar_lea.vmem [#allocation11], %s1326_s30  ;;  %v316_v0 = vld [vmem:[#allocation6] sm:$0xff] (!%p1327_p12) }
  0x90   : > { %315 = sbr.rel (%p1327_p12) target bundleno = 151 (0x97), region = 60  ;;  %317 = vst [vmem:[#allocation2] sm:$0xff] (!%p1327_p12), %v316_v0 }
  0x97 PF: > { %v1496_v1 = vld [vmem:[#allocation8 + $0x4] ss:$8 sps:$4 sm:$0xff]   ;;  %v1794_v3 = vmov 0   ;;  %v1500_v4 = vld [vmem:[#allocation8] ss:$8 sps:$4 sm:$0xff]   ;;  %v552_v34 = vld [vmem:[#allocation2] sm:$0xff]  ;;  %v344_v40 = vlaneseq }
  0x98   : > { %v2052_v2 = vld [vmem:[#allocation9 + $0x4] ss:$8 sps:$4 sm:$0xff]   ;;  %490 = vmatprep.mubr.bf16.mxu0 %v1794_v3  ;;  %666 = vmatprep.mubr.bf16.mxu1 %v1794_v3  ;;  %v2056_v5 = vld [vmem:[#allocation9] ss:$8 sps:$4 sm:$0xff]   ;;  %v1502_v6 = vld [vmem:[#allocation8 + $0x14] ss:$8 sps:$4 sm:$0xff]   ;;  %v553_v36 = vpack.c.bf16 %v552_v34, %v552_v34 }
  0x99   : > { %458 = vmatprep.subr.bf16.mxu0 %v1496_v1  ;;  %634 = vmatprep.subr.bf16.mxu1 %v2052_v2  ;;  %v2060_v7 = vld [vmem:[#allocation9 + $0x14] ss:$8 sps:$4 sm:$0xff]   ;;  %v1506_v8 = vld [vmem:[#allocation8 + $0x10] ss:$8 sps:$4 sm:$0xff]   ;;  %v1508_v10 = vld [vmem:[#allocation8 + $0x24] ss:$8 sps:$4 sm:$0xff]  }
  0x9a   : > { %459 = vmatpush1.bf16.msra.mxu0 %v1500_v4  ;;  %635 = vmatpush1.bf16.msra.mxu1 %v2056_v5  ;;  %v2062_v9 = vld [vmem:[#allocation9 + $0x10] ss:$8 sps:$4 sm:$0xff]   ;;  %v2065_v11 = vld [vmem:[#allocation9 + $0x24] ss:$8 sps:$4 sm:$0xff]   ;;  %v1512_v12 = vld [vmem:[#allocation8 + $0x20] ss:$8 sps:$4 sm:$0xff]  }
  0x9b   : > { %460 = vmatprep.subr.bf16.mxu0 %v1502_v6  ;;  %636 = vmatprep.subr.bf16.mxu1 %v2060_v7  ;;  %v2067_v13 = vld [vmem:[#allocation9 + $0x20] ss:$8 sps:$4 sm:$0xff]   ;;  %v1514_v14 = vld [vmem:[#allocation8 + $0x34] ss:$8 sps:$4 sm:$0xff]   ;;  %v1518_v16 = vld [vmem:[#allocation8 + $0x30] ss:$8 sps:$4 sm:$0xff]  }
  0x9c   : > { %v2071_v15 = vld [vmem:[#allocation9 + $0x34] ss:$8 sps:$4 sm:$0xff]   ;;  %v2074_v17 = vld [vmem:[#allocation9 + $0x30] ss:$8 sps:$4 sm:$0xff]   ;;  %v1520_v18 = vld [vmem:[#allocation8 + $0x44] ss:$8 sps:$4 sm:$0xff]  }
  0x9d   : > { %v2077_v19 = vld [vmem:[#allocation9 + $0x44] ss:$8 sps:$4 sm:$0xff]   ;;  %v1524_v20 = vld [vmem:[#allocation8 + $0x40] ss:$8 sps:$4 sm:$0xff]   ;;  %v1526_v22 = vld [vmem:[#allocation8 + $0x54] ss:$8 sps:$4 sm:$0xff]  }
  0x9e   : > { %461 = vmatpush1.bf16.msra.mxu0 %v1506_v8  ;;  %637 = vmatpush1.bf16.msra.mxu1 %v2062_v9  ;;  %v2079_v21 = vld [vmem:[#allocation9 + $0x40] ss:$8 sps:$4 sm:$0xff]   ;;  %v2083_v23 = vld [vmem:[#allocation9 + $0x54] ss:$8 sps:$4 sm:$0xff]   ;;  %v1530_v24 = vld [vmem:[#allocation8 + $0x50] ss:$8 sps:$4 sm:$0xff]  }
  0x9f   : > { %462 = vmatprep.subr.bf16.mxu0 %v1508_v10  ;;  %638 = vmatprep.subr.bf16.mxu1 %v2065_v11  ;;  %v2086_v25 = vld [vmem:[#allocation9 + $0x50] ss:$8 sps:$4 sm:$0xff]   ;;  %v1532_v26 = vld [vmem:[#allocation8 + $0x64] ss:$8 sps:$4 sm:$0xff]   ;;  %v1536_v28 = vld [vmem:[#allocation8 + $0x60] ss:$8 sps:$4 sm:$0xff]  }
  0xa0   : > { %v2089_v27 = vld [vmem:[#allocation9 + $0x64] ss:$8 sps:$4 sm:$0xff]   ;;  %v2092_v29 = vld [vmem:[#allocation9 + $0x60] ss:$8 sps:$4 sm:$0xff]   ;;  %v1538_v30 = vld [vmem:[#allocation8 + $0x74] ss:$8 sps:$4 sm:$0xff]  }
  0xa1   : > { %v2095_v31 = vld [vmem:[#allocation9 + $0x74] ss:$8 sps:$4 sm:$0xff]   ;;  %v1542_v32 = vld [vmem:[#allocation8 + $0x70] ss:$8 sps:$4 sm:$0xff]   ;;  %v1545_v37 = vld [vmem:[%s2034_s16 + $0x8] sm:$0xff]   ;;  %v345_v41 = vshrl.u32 %v344_v40, 7 }
  0xa2   : > { %463 = vmatpush1.bf16.msra.mxu0 %v1512_v12  ;;  %639 = vmatpush1.bf16.msra.mxu1 %v2067_v13  ;;  %v2098_v33 = vld [vmem:[#allocation9 + $0x70] ss:$8 sps:$4 sm:$0xff]   ;;  %v1546_v38 = vld [vmem:[%s2034_s16 + $0x10] sm:$0xff]   ;;  %s1395_s7 = sshll.u32 %s1776_s21, 10  ;;  %s1194_s14 = sshll.u32 %s2049_s27, 4  ;;  %s2349_s14 = int_to_ptr.vmem [resolvable:$true] %s1194_s14 }
  0xa3   : > { %464 = vmatprep.subr.bf16.mxu0 %v1514_v14  ;;  %640 = vmatprep.subr.bf16.mxu1 %v2071_v15  ;;  %v1544_v35 = vld [vmem:[%s2034_s16] sm:$0xff]   ;;  %v1547_v39 = vld [vmem:[%s2034_s16 + $0x18] sm:$0xff]   ;;  %v346_v42 = vsub.s32 0, %v345_v41  ;;  %v350_v44 = vsub.s32 1, %v345_v41  ;;  %s2347_s8 = scalar_lea.hbm %s2404_s5, %s1395_s7  ;;  %s1178_s1 = scalar_lea.sflag [#allocation5], %s2030_s12 }
  0xa4   : > { %v342_v43 = vld [vmem:[%s2403_s4] sm:$0x3]  ;;  %s1694_s15 = scalar_lea.vmem %s2349_s14, 1024  ;;  %s1795_s21 = smov [#allocation11]  }
  0xa5   : > { %v347_v45 = vrot.slane %v342_v43, %v346_v42  ;;  %v351_v46 = vrot.slane %v342_v43, %v350_v44  ;;  %p1695_p1 = scmp.ne.s32.totalorder %s2349_s14, %s1694_s15  ;;  %s1698_s17 = sshll.u32 %s1795_s21, 4  ;;  %s1699_s17 = int_to_ptr.vmem [resolvable:$false] %s1698_s17 }
  0xa6   : > { %465 = vmatpush1.bf16.msra.mxu0 %v1518_v16  ;;  %641 = vmatpush1.bf16.msra.mxu1 %v2074_v17  ;;  %s1700_s11 = scalar_lea.vmem %s1699_s17, 2048  ;;  %p1701_p8 = scmp.lt.s32.totalorder %s2349_s14, %s1699_s17 }
  0xa7   : > { %466 = vmatprep.subr.bf16.mxu0 %v1520_v18  ;;  %642 = vmatprep.subr.bf16.mxu1 %v2077_v19  ;;  %p1696_p4 = pnand %p1695_p1, %p1972_p2  ;;  %p1702_p0 = scmp.lt.s32.totalorder %s1700_s11, %s1694_s15 }
  0xa9   : > { %p1697_p6 = pneg %p1696_p4  ;;  %p1703_p5 = por %p1702_p0, %p1701_p8 }
  0xaa   : > { %467 = vmatpush1.bf16.msra.mxu0 %v1524_v20  ;;  %643 = vmatpush1.bf16.msra.mxu1 %v2079_v21 }
  0xab   : > { %468 = vmatprep.subr.bf16.mxu0 %v1526_v22  ;;  %644 = vmatprep.subr.bf16.mxu1 %v2083_v23  ;;  %p1704_p10 = pnand %p1703_p5, %p1697_p6 }
  0xae   : > { %469 = vmatpush1.bf16.msra.mxu0 %v1530_v24  ;;  %645 = vmatpush1.bf16.msra.mxu1 %v2086_v25 }
  0xaf   : > { %470 = vmatprep.subr.bf16.mxu0 %v1532_v26  ;;  %646 = vmatprep.subr.bf16.mxu1 %v2089_v27 }
  0xb2   : > { %471 = vmatpush1.bf16.msra.mxu0 %v1536_v28  ;;  %647 = vmatpush1.bf16.msra.mxu1 %v2092_v29 }
  0xb3   : > { %472 = vmatprep.subr.bf16.mxu0 %v1538_v30  ;;  %648 = vmatprep.subr.bf16.mxu1 %v2095_v31 }
  0xb6   : > { %473 = vmatpush1.bf16.msra.mxu0 %v1542_v32  ;;  %649 = vmatpush1.bf16.msra.mxu1 %v2098_v33 }
  0xb7   : > { %701 = vmatprep.subr.bf16.mxu0 %v2052_v2  ;;  %769 = vmatprep.subr.bf16.mxu1 %v2052_v2 }
  0xb9   : > { %491 = vmatmul.mubr.bf16.vlgmr.msra.gmra.mrb[0].mxu0 %v1544_v35  ;;  %667 = vmatmul.mubr.bf16.vlgmr.msra.gmra.mrb[0].mxu1 %v553_v36 }
  0xba   : > { %702 = vmatpush1.bf16.msra.mxu0 %v2056_v5  ;;  %500 = vmatprep.mubr.bf16.mxu0 %v1794_v3 }
  0xbb   : > { %703 = vmatprep.subr.bf16.mxu0 %v2060_v7  ;;  %770 = vmatpush1.bf16.msra.mxu1 %v2056_v5 }
  0xbc   : > { %771 = vmatprep.subr.bf16.mxu1 %v2060_v7  ;;  %801 = vmatprep.mubr.bf16.mxu1 %v1794_v3 }
  0xbe   : > { %704 = vmatpush1.bf16.msra.mxu0 %v2062_v9 }
  0xbf   : > { %705 = vmatprep.subr.bf16.mxu0 %v2065_v11  ;;  %772 = vmatpush1.bf16.msra.mxu1 %v2062_v9 }
  0xc0   : > { %773 = vmatprep.subr.bf16.mxu1 %v2065_v11 }
  0xc1   : > { %501 = vmatmul.mubr.bf16.gmra.mrb[4].mxu0 %v1545_v37 }
  0xc2   : > { %706 = vmatpush1.bf16.msra.mxu0 %v2067_v13  ;;  %510 = vmatprep.mubr.bf16.mxu0 %v1794_v3 }
  0xc3   : > { %707 = vmatprep.subr.bf16.mxu0 %v2071_v15  ;;  %774 = vmatpush1.bf16.msra.mxu1 %v2067_v13 }
  0xc4   : > { %775 = vmatprep.subr.bf16.mxu1 %v2071_v15 }
  0xc6   : > { %708 = vmatpush1.bf16.msra.mxu0 %v2074_v17 }
  0xc7   : > { %709 = vmatprep.subr.bf16.mxu0 %v2077_v19  ;;  %776 = vmatpush1.bf16.msra.mxu1 %v2074_v17 }
  0xc8   : > { %777 = vmatprep.subr.bf16.mxu1 %v2077_v19 }
  0xc9   : > { %511 = vmatmul.mubr.bf16.gmra.mrb[8].mxu0 %v1546_v38 }
  0xca   : > { %710 = vmatpush1.bf16.msra.mxu0 %v2079_v21  ;;  %520 = vmatprep.mubr.bf16.mxu0 %v1794_v3 }
  0xcb   : > { %711 = vmatprep.subr.bf16.mxu0 %v2083_v23  ;;  %778 = vmatpush1.bf16.msra.mxu1 %v2079_v21 }
  0xcc   : > { %779 = vmatprep.subr.bf16.mxu1 %v2083_v23 }
  0xce   : > { %712 = vmatpush1.bf16.msra.mxu0 %v2086_v25 }
  0xcf   : > { %713 = vmatprep.subr.bf16.mxu0 %v2089_v27  ;;  %780 = vmatpush1.bf16.msra.mxu1 %v2086_v25 }
  0xd0   : > { %781 = vmatprep.subr.bf16.mxu1 %v2089_v27 }
  0xd1   : > { %521 = vmatmul.mubr.bf16.gmra.mrb[12].mxu0 %v1547_v39 }
  0xd2   : > { %714 = vmatpush1.bf16.msra.mxu0 %v2092_v29  ;;  %733 = vmatprep.mubr.bf16.mxu0 %v1794_v3 }
  0xd3   : > { %715 = vmatprep.subr.bf16.mxu0 %v2095_v31  ;;  %782 = vmatpush1.bf16.msra.mxu1 %v2092_v29 }
  0xd4   : > { %783 = vmatprep.subr.bf16.mxu1 %v2095_v31 }
  0xd6   : > { %716 = vmatpush1.bf16.msra.mxu0 %v2098_v33 }
  0xd7   : > { %784 = vmatpush1.bf16.msra.mxu1 %v2098_v33  ;;  %837 = vmatprep.subr.bf16.mxu0 %v2052_v2 }
  0xd8   : > { %905 = vmatprep.subr.bf16.mxu1 %v2052_v2 }
 0x18c   : > { %v492_v47 = vpop.f32.mrb[0].mxu0  ;;  %v668_v48 = vpop.f32.mrb[0].mxu1 }
 0x18d   : > { %v493_v49 = vadd.f32 %v492_v47, %v347_v45  ;;  %v494_v50 = vpop.f32.mrb[1].mxu0  ;;  %v670_v51 = vpop.f32.mrb[1].mxu1 }
 0x18e   : > { %v495_v52 = vadd.f32 %v494_v50, %v351_v46  ;;  %v496_v53 = vpop.f32.mrb[2].mxu0  ;;  %v672_v54 = vpop.f32.mrb[2].mxu1 }
 0x18f   : > { %v2148_v55 = vadd.f32 %v668_v48, %v493_v49  ;;  %v497_v56 = vadd.f32 %v496_v53, %v347_v45  ;;  %v498_v57 = vpop.f32.mrb[3].mxu0  ;;  %v673_v58 = vpop.f32.mrb[3].mxu1 }
 0x190   : > { %v2150_v59 = vadd.f32 %v670_v51, %v495_v52  ;;  %v499_v60 = vadd.f32 %v498_v57, %v351_v46 }
 0x191   : > { %v700_v61 = vpack.c.bf16 %v2148_v55, %v2148_v55 }
 0x192   : > { %677 = vmax.xlane.f32.xlu0 %v2150_v59 }
 0x193   : > { %734 = vmatmul.mubr.bf16.vlgmr.msra.gmra.mrb[16].mxu0 %v700_v61 }
 0x194   : > { %838 = vmatpush1.bf16.msra.mxu0 %v2056_v5  ;;  %869 = vmatprep.mubr.bf16.mxu0 %v1794_v3  ;;  %v502_v62 = vpop.f32.mrb[4].mxu0 }
 0x195   : > { %839 = vmatprep.subr.bf16.mxu0 %v2060_v7  ;;  %v503_v63 = vadd.f32 %v502_v62, %v347_v45  ;;  %v504_v0 = vpop.f32.mrb[5].mxu0 }
 0x196   : > { %v505_v1 = vadd.f32 %v504_v0, %v351_v46  ;;  %v506_v4 = vpop.f32.mrb[6].mxu0 }
 0x197   : > { %v2166_v6 = vadd.f32 %v506_v4, %v347_v45  ;;  %v508_v8 = vpop.f32.mrb[7].mxu0 }
 0x198   : > { %840 = vmatpush1.bf16.msra.mxu0 %v2062_v9  ;;  %v2168_v10 = vadd.f32 %v508_v8, %v351_v46 }
 0x199   : > { %841 = vmatprep.subr.bf16.mxu0 %v2065_v11 }
 0x19c   : > { %842 = vmatpush1.bf16.msra.mxu0 %v2067_v13  ;;  %v512_v12 = vpop.f32.mrb[8].mxu0 }
 0x19d   : > { %843 = vmatprep.subr.bf16.mxu0 %v2071_v15  ;;  %v2171_v14 = vadd.f32 %v512_v12, %v347_v45  ;;  %v514_v16 = vpop.f32.mrb[9].mxu0 }
 0x19e   : > { %v2174_v18 = vadd.f32 %v514_v16, %v351_v46  ;;  %v516_v20 = vpop.f32.mrb[10].mxu0 }
 0x19f   : > { %v2176_v22 = vadd.f32 %v516_v20, %v347_v45  ;;  %v518_v24 = vpop.f32.mrb[11].mxu0 }
 0x1a0   : > { %844 = vmatpush1.bf16.msra.mxu0 %v2074_v17  ;;  %v2178_v26 = vadd.f32 %v518_v24, %v351_v46 }
 0x1a1   : > { %845 = vmatprep.subr.bf16.mxu0 %v2077_v19 }
 0x1a4   : > { %846 = vmatpush1.bf16.msra.mxu0 %v2079_v21  ;;  %v522_v28 = vpop.f32.mrb[12].mxu0 }
 0x1a5   : > { %847 = vmatprep.subr.bf16.mxu0 %v2083_v23  ;;  %v2181_v30 = vadd.f32 %v522_v28, %v347_v45  ;;  %v524_v32 = vpop.f32.mrb[13].mxu0 }
 0x1a6   : > { %v2184_v34 = vadd.f32 %v524_v32, %v351_v46  ;;  %v526_v35 = vpop.f32.mrb[14].mxu0 }
 0x1a7   : > { %v2186_v36 = vadd.f32 %v526_v35, %v347_v45  ;;  %v528_v37 = vpop.f32.mrb[15].mxu0 }
 0x1a8   : > { %848 = vmatpush1.bf16.msra.mxu0 %v2086_v25  ;;  %v2188_v38 = vadd.f32 %v528_v37, %v351_v46 }
 0x1a9   : > { %849 = vmatprep.subr.bf16.mxu0 %v2089_v27 }
 0x1ac   : > { %850 = vmatpush1.bf16.msra.mxu0 %v2092_v29 }
 0x1ad   : > { %851 = vmatprep.subr.bf16.mxu0 %v2095_v31 }
 0x1b0   : > { %852 = vmatpush1.bf16.msra.mxu0 %v2098_v33 }
 0x1b1   : > { %973 = vmatprep.subr.bf16.mxu0 %v2052_v2 }
 0x266   : > { %v735_v39 = vpop.f32.mrb[16].mxu0 }
 0x267   : > { %v2192_v40 = vadd.f32 %v735_v39, %v497_v56  ;;  %v737_v41 = vpop.f32.mrb[17].mxu0 }
 0x268   : > { %v2194_v42 = vadd.f32 %v737_v41, %v499_v60  ;;  %v739_v43 = vpop.f32.mrb[18].mxu0 }
 0x269   : > { %v768_v44 = vpack.c.bf16 %v2192_v40, %v2192_v40  ;;  %v740_v47 = vpop.f32.mrb[19].mxu0 }
 0x26a   : > { %744 = vmax.xlane.f32.xlu0 %v2194_v42 }
 0x26b   : > { %802 = vmatmul.mubr.bf16.vlgmr.msra.gmra.mrb[4].mxu1 %v768_v44 }
 0x26c   : > { %906 = vmatpush1.bf16.msra.mxu1 %v2056_v5  ;;  %937 = vmatprep.mubr.bf16.mxu1 %v1794_v3 }
 0x26d   : > { %907 = vmatprep.subr.bf16.mxu1 %v2060_v7 }
 0x270   : > { %908 = vmatpush1.bf16.msra.mxu1 %v2062_v9 }
 0x271   : > { %909 = vmatprep.subr.bf16.mxu1 %v2065_v11 }
 0x274   : > { %910 = vmatpush1.bf16.msra.mxu1 %v2067_v13 }
 0x275   : > { %911 = vmatprep.subr.bf16.mxu1 %v2071_v15 }
 0x278   : > { %912 = vmatpush1.bf16.msra.mxu1 %v2074_v17 }
 0x279   : > { %913 = vmatprep.subr.bf16.mxu1 %v2077_v19 }
 0x27c   : > { %914 = vmatpush1.bf16.msra.mxu1 %v2079_v21 }
 0x27d   : > { %915 = vmatprep.subr.bf16.mxu1 %v2083_v23 }
 0x280   : > { %916 = vmatpush1.bf16.msra.mxu1 %v2086_v25 }
 0x281   : > { %917 = vmatprep.subr.bf16.mxu1 %v2089_v27 }
 0x284   : > { %918 = vmatpush1.bf16.msra.mxu1 %v2092_v29 }
 0x285   : > { %919 = vmatprep.subr.bf16.mxu1 %v2095_v31 }
 0x288   : > { %920 = vmatpush1.bf16.msra.mxu1 %v2098_v33 }
 0x289   : > { %1041 = vmatprep.subr.bf16.mxu1 %v2052_v2 }
 0x33e   : > { %v803_v45 = vpop.f32.mrb[4].mxu1 }
 0x33f   : > { %v2216_v46 = vadd.f32 %v803_v45, %v503_v63  ;;  %v805_v48 = vpop.f32.mrb[5].mxu1 }
 0x340   : > { %v2218_v49 = vadd.f32 %v805_v48, %v505_v1  ;;  %v807_v50 = vpop.f32.mrb[6].mxu1 }
 0x341   : > { %v836_v51 = vpack.c.bf16 %v2216_v46, %v2216_v46  ;;  %v808_v52 = vpop.f32.mrb[7].mxu1 }
 0x342   : > { %812 = vmax.xlane.f32.xlu1 %v2218_v49 }
 0x343   : > { %870 = vmatmul.mubr.bf16.vlgmr.msra.gmra.mrb[20].mxu0 %v836_v51 }
 0x344   : > { %974 = vmatpush1.bf16.msra.mxu0 %v2056_v5  ;;  %1005 = vmatprep.mubr.bf16.mxu0 %v1794_v3 }
 0x345   : > { %975 = vmatprep.subr.bf16.mxu0 %v2060_v7 }
 0x348   : > { %976 = vmatpush1.bf16.msra.mxu0 %v2062_v9 }
 0x349   : > { %977 = vmatprep.subr.bf16.mxu0 %v2065_v11 }
 0x34c   : > { %978 = vmatpush1.bf16.msra.mxu0 %v2067_v13 }
 0x34d   : > { %979 = vmatprep.subr.bf16.mxu0 %v2071_v15 }
 0x350   : > { %980 = vmatpush1.bf16.msra.mxu0 %v2074_v17 }
 0x351   : > { %981 = vmatprep.subr.bf16.mxu0 %v2077_v19 }
 0x354   : > { %982 = vmatpush1.bf16.msra.mxu0 %v2079_v21 }
 0x355   : > { %983 = vmatprep.subr.bf16.mxu0 %v2083_v23 }
 0x358   : > { %984 = vmatpush1.bf16.msra.mxu0 %v2086_v25 }
 0x359   : > { %985 = vmatprep.subr.bf16.mxu0 %v2089_v27 }
 0x35c   : > { %986 = vmatpush1.bf16.msra.mxu0 %v2092_v29 }
 0x35d   : > { %987 = vmatprep.subr.bf16.mxu0 %v2095_v31 }
 0x360   : > { %988 = vmatpush1.bf16.msra.mxu0 %v2098_v33 }
 0x361   : > { %1109 = vmatprep.subr.bf16.mxu0 %v2052_v2 }
 0x416   : > { %v871_v53 = vpop.f32.mrb[20].mxu0 }
 0x417   : > { %v2241_v54 = vadd.f32 %v871_v53, %v2166_v6  ;;  %v873_v56 = vpop.f32.mrb[21].mxu0 }
 0x418   : > { %v2244_v57 = vadd.f32 %v873_v56, %v2168_v10  ;;  %v875_v58 = vpop.f32.mrb[22].mxu0 }
 0x419   : > { %v904_v60 = vpack.c.bf16 %v2241_v54, %v2241_v54  ;;  %v876_v61 = vpop.f32.mrb[23].mxu0 }
 0x41a   : > { %880 = vmax.xlane.f32.xlu1 %v2244_v57 }
 0x41b   : > { %938 = vmatmul.mubr.bf16.vlgmr.msra.gmra.mrb[8].mxu1 %v904_v60 }
 0x41c   : > { %1042 = vmatpush1.bf16.msra.mxu1 %v2056_v5  ;;  %1073 = vmatprep.mubr.bf16.mxu1 %v1794_v3 }
 0x41d   : > { %1043 = vmatprep.subr.bf16.mxu1 %v2060_v7 }
 0x420   : > { %1044 = vmatpush1.bf16.msra.mxu1 %v2062_v9 }
 0x421   : > { %1045 = vmatprep.subr.bf16.mxu1 %v2065_v11 }
 0x424   : > { %1046 = vmatpush1.bf16.msra.mxu1 %v2067_v13 }
 0x425   : > { %1047 = vmatprep.subr.bf16.mxu1 %v2071_v15 }
 0x428   : > { %1048 = vmatpush1.bf16.msra.mxu1 %v2074_v17 }
 0x429   : > { %1049 = vmatprep.subr.bf16.mxu1 %v2077_v19 }
 0x42c   : > { %1050 = vmatpush1.bf16.msra.mxu1 %v2079_v21 }
 0x42d   : > { %1051 = vmatprep.subr.bf16.mxu1 %v2083_v23 }
 0x430   : > { %1052 = vmatpush1.bf16.msra.mxu1 %v2086_v25 }
 0x431   : > { %1053 = vmatprep.subr.bf16.mxu1 %v2089_v27 }
 0x434   : > { %1054 = vmatpush1.bf16.msra.mxu1 %v2092_v29 }
 0x435   : > { %1055 = vmatprep.subr.bf16.mxu1 %v2095_v31 }
 0x438   : > { %1056 = vmatpush1.bf16.msra.mxu1 %v2098_v33 }
 0x4ee   : > { %v939_v2 = vpop.f32.mrb[8].mxu1 }
 0x4ef   : > { %v2266_v62 = vadd.f32 %v939_v2, %v2171_v14  ;;  %v941_v63 = vpop.f32.mrb[9].mxu1 }
 0x4f0   : > { %v2269_v0 = vadd.f32 %v941_v63, %v2174_v18  ;;  %v943_v1 = vpop.f32.mrb[10].mxu1 }
 0x4f1   : > { %v972_v4 = vpack.c.bf16 %v2266_v62, %v2266_v62  ;;  %v944_v6 = vpop.f32.mrb[11].mxu1 }
 0x4f2   : > { %948 = vmax.xlane.f32.xlu0 %v2269_v0 }
 0x4f3   : > { %1006 = vmatmul.mubr.bf16.vlgmr.msra.gmra.mrb[24].mxu0 %v972_v4 }
 0x4f4   : > { %1110 = vmatpush1.bf16.msra.mxu0 %v2056_v5  ;;  %1141 = vmatprep.mubr.bf16.mxu0 %v1794_v3 }
 0x4f5   : > { %1111 = vmatprep.subr.bf16.mxu0 %v2060_v7 }
 0x4f8   : > { %1112 = vmatpush1.bf16.msra.mxu0 %v2062_v9 }
 0x4f9   : > { %1113 = vmatprep.subr.bf16.mxu0 %v2065_v11 }
 0x4fc   : > { %1114 = vmatpush1.bf16.msra.mxu0 %v2067_v13 }
 0x4fd   : > { %1115 = vmatprep.subr.bf16.mxu0 %v2071_v15 }
 0x500   : > { %1116 = vmatpush1.bf16.msra.mxu0 %v2074_v17  ;;  %v678_v17 = vpop.xlane.xlu0 %677 }
 0x501   : > { %1117 = vmatprep.subr.bf16.mxu0 %v2077_v19  ;;  %v679_v19 = vsub.f32 %v2150_v59, %v678_v17 }
 0x504   : > { %1118 = vmatpush1.bf16.msra.mxu0 %v2079_v21  ;;  %v2300_v21 = vpop.xlane.xlu0 %744 }
 0x505   : > { %1119 = vmatprep.subr.bf16.mxu0 %v2083_v23  ;;  %v813_v23 = vpop.xlane.xlu1 %812 }
 0x508   : > { %1120 = vmatpush1.bf16.msra.mxu0 %v2086_v25  ;;  %v680_v25 = vmul.f32 1.442695, %v679_v19 }
 0x509   : > { %1121 = vmatprep.subr.bf16.mxu0 %v2089_v27  ;;  %v814_v27 = vsub.f32 %v2218_v49, %v813_v23  ;;  %v881_v1 = vpop.xlane.xlu1 %880 }
 0x50a   : > { %1548 = vpow2.f32 %v680_v25 }
 0x50c   : > { %1122 = vmatpush1.bf16.msra.mxu0 %v2092_v29 }
 0x50d   : > { %1123 = vmatprep.subr.bf16.mxu0 %v2095_v31  ;;  %v815_v31 = vmul.f32 1.442695, %v814_v27 }
 0x50f   : > { %1550 = vpow2.f32 %v815_v31 }
 0x510   : > { %1124 = vmatpush1.bf16.msra.mxu0 %v2098_v33 }
 0x514   : > { %v1549_v24 = vpop.eup %1548 }
 0x57f   : > { %v949_v29 = vpop.xlane.xlu0 %948 }
 0x580   : > { %v950_v33 = vsub.f32 %v2269_v0, %v949_v29 }
 0x582   : > { %v951_v10 = vmul.f32 1.442695, %v950_v33 }
 0x584   : > { %1552 = vpow2.f32 %v951_v10 }
 0x5c6   : > { %v1007_v3 = vpop.f32.mrb[24].mxu0 }
 0x5c7   : > { %v2291_v5 = vadd.f32 %v1007_v3, %v2176_v22  ;;  %v1009_v7 = vpop.f32.mrb[25].mxu0 }
 0x5c8   : > { %v2294_v9 = vadd.f32 %v1009_v7, %v2178_v26  ;;  %v1011_v11 = vpop.f32.mrb[26].mxu0  ;;  %v1551_v26 = vpop.eup %1550 }
 0x5c9   : > { %v1040_v13 = vpack.c.bf16 %v2291_v5, %v2291_v5  ;;  %v1012_v15 = vpop.f32.mrb[27].mxu0  ;;  %v1553_v28 = vpop.eup %1552 }
 0x5ca   : > { %1016 = vmax.xlane.f32.xlu1 %v2294_v9 }
 0x5cb   : > { %1074 = vmatmul.mubr.bf16.vlgmr.msra.gmra.mrb[12].mxu1 %v1040_v13 }
 0x657   : > { %v1017_v6 = vpop.xlane.xlu1 %1016 }
 0x658   : > { %v1018_v3 = vsub.f32 %v2294_v9, %v1017_v6 }
 0x65a   : > { %v1019_v7 = vmul.f32 1.442695, %v1018_v3 }
 0x69e   : > { %v1075_v8 = vpop.f32.mrb[12].mxu1 }
 0x69f   : > { %v2305_v12 = vadd.f32 %v1075_v8, %v2181_v30  ;;  %v1077_v14 = vpop.f32.mrb[13].mxu1 }
 0x6a0   : > { %v2308_v16 = vadd.f32 %v1077_v14, %v2184_v34  ;;  %v1079_v18 = vpop.f32.mrb[14].mxu1 }
 0x6a1   : > { %v1108_v20 = vpack.c.bf16 %v2305_v12, %v2305_v12  ;;  %v1080_v22 = vpop.f32.mrb[15].mxu1 }
 0x6a2   : > { %1084 = vmax.xlane.f32.xlu0 %v2308_v16 }
 0x6a3   : > { %1142 = vmatmul.mubr.bf16.vlgmr.msra.gmra.mrb[28].mxu0 %v1108_v20 }
 0x6a6   : > { %682 = vadd.xlane.f32.xlu0 %v1549_v24 }
 0x6aa   : > { %817 = vadd.xlane.f32.xlu0 %v1551_v26 }
 0x6ae   : > { %953 = vadd.xlane.f32.xlu0 %v1553_v28 }
 0x72f   : > { %v1085_v30 = vpop.xlane.xlu0 %1084 }
 0x730   : > { %v1086_v32 = vsub.f32 %v2308_v16, %v1085_v30 }
 0x732   : > { %v1087_v34 = vmul.f32 1.442695, %v1086_v32 }
 0x733   : > { %v683_v35 = vpop.xlane.xlu0 %682 }
 0x734   : > { %1554 = vpow2.f32 %v1087_v34 }
 0x735   : > { %1556 = vlog2.f32 %v683_v35 }
 0x737   : > { %v818_v37 = vpop.xlane.xlu0 %817 }
 0x738   : > { %1558 = vlog2.f32 %v818_v37 }
 0x73b   : > { %v954_v39 = vpop.xlane.xlu0 %953 }
 0x73c   : > { %1560 = vlog2.f32 %v954_v39 }
 0x73e   : > { %v1555_v41 = vpop.eup %1554 }
 0x73f   : > { %v1557_v43 = vpop.eup %1556  ;;  %1089 = vadd.xlane.f32.xlu0 %v1555_v41 }
 0x740   : > { %v685_v44 = vmul.f32 0.6931472, %v1557_v43 }
 0x742   : > { %v1559_v47 = vpop.eup %1558  ;;  %v686_v45 = vadd.f32 %v685_v44, %v678_v17 }
 0x743   : > { %v820_v48 = vmul.f32 0.6931472, %v1559_v47 }
 0x744   : > { %v690_v50 = vsub.f32 %v2150_v59, %v686_v45  ;;  %v746_v59 = vsub.f32 %v2194_v42, %v2300_v21 }
 0x745   : > { %v821_v51 = vadd.f32 %v820_v48, %v813_v23 }
 0x746   : > { %v1561_v52 = vpop.eup %1560  ;;  %v1386_v53 = vpack.c.bf16 %v690_v50, %v2148_v55  ;;  %v747_v4 = vmul.f32 1.442695, %v746_v59  ;;  %v882_v55 = vsub.f32 %v2244_v57, %v881_v1 }
 0x747   : > { %v825_v56 = vsub.f32 %v2218_v49, %v821_v51  ;;  %v956_v58 = vmul.f32 0.6931472, %v1561_v52 }
 0x748   : > { %699 = vst [vmem:[%s2049_s27] sm:$0xff] %v1386_v53  ;;  %1562 = vpow2.f32 %v747_v4  ;;  %v883_v49 = vmul.f32 1.442695, %v882_v55 }
 0x749   : > { %v1388_v60 = vpack.c.bf16 %v825_v56, %v2216_v46  ;;  %v957_v61 = vadd.f32 %v956_v58, %v949_v29 }
 0x74a   : > { %1564 = vpow2.f32 %v883_v49 }
 0x74b   : > { %1368 = vst [vmem:[%s2049_s27 + $0x10] sm:$0xff] %v1388_v60  ;;  %v961_v2 = vsub.f32 %v2269_v0, %v957_v61  ;;  %1566 = vpow2.f32 %v1019_v7 }
 0x74d   : > { %v1390_v63 = vpack.c.bf16 %v961_v2, %v2266_v62 }
 0x74f   : > { %1372 = vst [vmem:[%s2049_s27 + $0x20] sm:$0xff] %v1390_v63 }
 0x752   : > { %v1563_v17 = vpop.eup %1562 }
 0x754   : > { %v1565_v19 = vpop.eup %1564 }
 0x755   : > { %v1567_v23 = vpop.eup %1566 }
 0x776   : > { %v1143_v46 = vpop.f32.mrb[28].mxu0 }
 0x777   : > { %v1150_v0 = vadd.f32 %v1143_v46, %v2186_v36  ;;  %v1145_v11 = vpop.f32.mrb[29].mxu0 }
 0x778   : > { %v1151_v62 = vadd.f32 %v1145_v11, %v2188_v38  ;;  %v1147_v13 = vpop.f32.mrb[30].mxu0 }
 0x779   : > { %1176 = vst [vmem:[#allocation2] sm:$0xff] %v1150_v0  ;;  %v1148_v15 = vpop.f32.mrb[31].mxu0 }
 0x77a   : > { %1152 = vmax.xlane.f32.xlu1 %v1151_v62 }
 0x77e   : > { %749 = vadd.xlane.f32.xlu1 %v1563_v17 }
 0x782   : > { %885 = vadd.xlane.f32.xlu1 %v1565_v19 }
 0x786   : > { %1021 = vadd.xlane.f32.xlu1 %v1567_v23 }
 0x7cc   : > { %v1090_v25 = vpop.xlane.xlu0 %1089 }
 0x7cd   : > { %1568 = vlog2.f32 %v1090_v25 }
 0x7d7   : > { %v1569_v27 = vpop.eup %1568 }
 0x7d8   : > { %v1092_v29 = vmul.f32 0.6931472, %v1569_v27 }
 0x7da   : > { %v1093_v36 = vadd.f32 %v1092_v29, %v1085_v30 }
 0x7dc   : > { %v1097_v31 = vsub.f32 %v2308_v16, %v1093_v36 }
 0x7de   : > { %v1392_v38 = vpack.c.bf16 %v1097_v31, %v2305_v12 }
 0x7e0   : > { %1376 = vst [vmem:[%s2049_s27 + $0x30] sm:$0xff] %v1392_v38 }
 0x807   : > { %v1153_v33 = vpop.xlane.xlu1 %1152 }
 0x808   : > { %v1154_v8 = vsub.f32 %v1151_v62, %v1153_v33 }
 0x80a   : > { %v1155_v10 = vmul.f32 1.442695, %v1154_v8 }
 0x80b   : > { %v750_v14 = vpop.xlane.xlu1 %749 }
 0x80c   : > { %1570 = vpow2.f32 %v1155_v10 }
 0x80d   : > { %1572 = vlog2.f32 %v750_v14 }
 0x80f   : > { %v886_v18 = vpop.xlane.xlu1 %885 }
 0x810   : > { %1574 = vlog2.f32 %v886_v18 }
 0x813   : > { %v1022_v20 = vpop.xlane.xlu1 %1021 }
 0x814   : > { %1576 = vlog2.f32 %v1022_v20 }
 0x816   : > { %v1571_v22 = vpop.eup %1570 }
 0x817   : > { %v1573_v24 = vpop.eup %1572  ;;  %1157 = vadd.xlane.f32.xlu1 %v1571_v22 }
 0x818   : > { %v752_v26 = vmul.f32 0.6931472, %v1573_v24 }
 0x81a   : > { %v1575_v16 = vpop.eup %1574  ;;  %v753_v12 = vadd.f32 %v752_v26, %v2300_v21 }
 0x81b   : > { %v888_v28 = vmul.f32 0.6931472, %v1575_v16 }
 0x81c   : > { %v757_v30 = vsub.f32 %v2194_v42, %v753_v12 }
 0x81d   : > { %v889_v32 = vadd.f32 %v888_v28, %v881_v1 }
 0x81e   : > { %v1577_v34 = vpop.eup %1576  ;;  %v1387_v35 = vpack.c.bf16 %v757_v30, %v2192_v40 }
 0x81f   : > { %v893_v37 = vsub.f32 %v2244_v57, %v889_v32  ;;  %v1024_v39 = vmul.f32 0.6931472, %v1577_v34 }
 0x820   : > { %1366 = vst [vmem:[%s2049_s27 + $0x8] sm:$0xff] %v1387_v35 }
 0x821   : > { %v1389_v41 = vpack.c.bf16 %v893_v37, %v2241_v54  ;;  %v1025_v43 = vadd.f32 %v1024_v39, %v1017_v6 }
 0x823   : > { %1370 = vst [vmem:[%s2049_s27 + $0x18] sm:$0xff] %v1389_v41  ;;  %v1029_v21 = vsub.f32 %v2294_v9, %v1025_v43 }
 0x825   : > { %v1391_v42 = vpack.c.bf16 %v1029_v21, %v2291_v5 }
 0x827   : > { %1374 = vst [vmem:[%s2049_s27 + $0x28] sm:$0xff] %v1391_v42 }
 0x8a4   : > { %v1158_v44 = vpop.xlane.xlu1 %1157 }
 0x8a5   : > { %1578 = vlog2.f32 %v1158_v44 }
 0x8af   : > { %v1579_v40 = vpop.eup %1578 }
 0x8b0   : > { %v1160_v47 = vmul.f32 0.6931472, %v1579_v40 }
 0x8b2   : > { %v1161_v45 = vadd.f32 %v1160_v47, %v1153_v33 }
 0x8b4   : > { %v1165_v57 = vsub.f32 %v1151_v62, %v1161_v45 }
 0x8b6   : > { %v1393_v54 = vpack.c.bf16 %v1165_v57, %v1150_v0 }
 0x8b8   : > { %1378 = vst [vmem:[%s2049_s27 + $0x38] sm:$0xff] %v1393_v54 }
 0x8b9   : > { %1707 = shalt.err (!%p1704_p10)
}
 0x8ba   : > { %s1708_s25 = scalar_lea.hbm %s2347_s8, 1024  ;;  %s1712_s27 = scalar_lea.hbm %s2404_s5, 2048 }
 0x8bb   : > { %p1709_p13 = scmp.ne.s32.totalorder %s2347_s8, %s1708_s25  ;;  %p1713_p7 = scmp.lt.u32.totalorder %s2347_s8, %s2404_s5 }
 0x8bc   : > { %p1714_p11 = scmp.lt.u32.totalorder %s1712_s27, %s1708_s25  ;;  %p1716_p1 = scmp.lt.u32.totalorder %s1708_s25, %s2347_s8 }
 0x8bd   : > { %p1710_p9 = pnand %p1709_p13, %p1972_p2 }
 0x8be   : > { %p1715_p12 = por %p1714_p11, %p1713_p7 }
 0x8bf   : > { %p1711_p3 = pneg %p1710_p9 }
 0x8c0   : > { %p1717_p4 = por %p1716_p1, %p1715_p12 }
 0x8c2   : > { %p1718_p6 = pnand %p1717_p4, %p1711_p3 }
 0x8c4   : > { %1721 = shalt.err (!%p1718_p6)
}
 0x8c5   : > { %s1796_s7 = smov 128   ;;  %s1797_s9 = smov 8  }
 0x8c6   : > { %1410 = dma.vmem_to_hbm [thread:$0]  (%p1972_p2), %s2349_s14, 1024, %s2347_s8, %s1178_s1, %s1796_s7, %s1796_s7, %s1797_s9  }
 0x8c7 PF: > { %s1209_s6 = sand.u32 1, %s1764_s18   ;;  %p2424_p8 = scmp.ne.s32.totalorder %s2413_s29, 0 }
 0x8c8   : > { %p2425_p0 = scmp.ge.s32.totalorder %s1784_s23, 2  ;;  %s1210_s15 = scalar_lea.sflag [#allocation5], %s1209_s6 }
 0x8ca   : > { %p1427_p5 = pnand %p2425_p0, %p2424_p8 }
 0x8cc   : > { %1759 = dma.done.wait (!%p1427_p5), %s1210_s15, 1024  }
 0x8cd   : > { %1761 = vsyncadd (!%p1427_p5), %s1210_s15, 4294966272  ;;  %s23_s23 = sadd.s32 1, %s1784_s23   ;;  %s2426_s18 = smov %s1768_s19 }
 0x8ce   : > { %p20_p10 = scmp.ge.s32.totalorder %s23_s23, 4   ;;  %s2427_s19 = smov %s1772_s20 }
 0x8cf   : > { %s2428_s20 = smov %s1984_s13  ;;  %s2429_s21 = smov %s1780_s22 }
 0x8d0   : > { %s2430_s22 = smov %s2432_s24  ;;  %22 = sbr.rel (!%p20_p10) target bundleno = 10 (0xa), region = 109 }
 0x8d7   :  { %1215 = vsyncpa [#allocation4], 1 }
 0x8d8   :  { %1217 = vsyncpa [#allocation4 + $0x1], 1 }
 0x8d9   :  { %1218 = vsyncpa [#allocation7], 1 }
 0x8da   :  { %1219 = vsyncpa [#allocation10], 1 }
 0x8db   :  { %1220 = vsyncpa [#allocation5], 1 }
 0x8dc   :  { %1222 = vsyncpa [#allocation5 + $0x1], 1 }

</bundles_post_ra>
